<compile_context>
chip_gen: v7x
topology: tpu7x:2x2x1
jax: 0.10.0
libtpu: 0.0.40
codegen_flags: <defaults>
</compile_context>

<pallas_src>
import jax
import jax.numpy as jnp
from jax.experimental import pallas as pl
from jax.experimental.pallas import tpu as pltpu


IN_DIM = 28 * 28                  # 784
H1, H2, OUT = 300, 100, 10        # logical feature sizes
H1P, H2P, OUTP = 384, 128, 128    # 128-lane-dense padded sizes
_EPS = 1e-5


# ----------------------------------------------------------------------------
# Kernel: whole batch resident in VMEM, three MXU matmuls, fused BN+ReLU.
# ----------------------------------------------------------------------------
def _mlp_kernel(x_ref,
                w1_ref, b1_ref, g1_ref, be1_ref,
                w2_ref, b2_ref, g2_ref, be2_ref,
                w3_ref, b3_ref,
                o_ref):
    inv_b = 1.0 / x_ref.shape[0]      # static batch size
    cdt = w1_ref.dtype                # MXU operand dtype (f32 or bf16)

    def linear_bn_relu(h_in, w_ref, b_ref, g_ref, be_ref):
        # MXU matmul with f32 accumulation; bias + BN math in f32 on the VPU.
        h = jnp.dot(h_in, w_ref[...], preferred_element_type=jnp.float32)
        h = h + b_ref[...]
        # One-pass batch statistics (sum and sum-of-squares).
        mu = jnp.sum(h, axis=0, keepdims=True) * inv_b
        msq = jnp.sum(h * h, axis=0, keepdims=True) * inv_b
        var = jnp.maximum(msq - mu * mu, 0.0)            # biased var, clamp fp noise
        scale = g_ref[...] * jax.lax.rsqrt(var + _EPS)   # rsqrt -> EUP slot
        shift = be_ref[...] - mu * scale
        return jnp.maximum(h * scale + shift, 0.0)       # fused FMA + ReLU

    h1 = linear_bn_relu(x_ref[...], w1_ref, b1_ref, g1_ref, be1_ref)
    h2 = linear_bn_relu(h1.astype(cdt), w2_ref, b2_ref, g2_ref, be2_ref)
    out = jnp.dot(h2.astype(cdt), w3_ref[...],
                  preferred_element_type=jnp.float32) + b3_ref[...]
    o_ref[...] = out.astype(o_ref.dtype)


# ----------------------------------------------------------------------------
# One-time parameter packing (do NOT call per forward).
# ----------------------------------------------------------------------------
def pack_params(params, compute_dtype=jnp.bfloat16):
    """Transpose Linear weights to (in, out), zero-pad every feature dim to a
    multiple of 128 lanes, cast MXU operands to `compute_dtype`; BN params and
    biases stay float32.  Padded columns are exactly zero through the net."""
    (w1, b1, g1, be1, w2, b2, g2, be2, w3, b3) = params

    def pad_w(wT, rows, cols):
        r, c = wT.shape
        return jnp.pad(wT.astype(jnp.float32), ((0, rows - r), (0, cols - c)))

    def pad_v(v, cols):
        return jnp.pad(v.astype(jnp.float32), (0, cols - v.shape[0])).reshape(1, cols)

    w1p = pad_w(w1.T, IN_DIM, H1P).astype(compute_dtype)
    w2p = pad_w(w2.T, H1P, H2P).astype(compute_dtype)
    w3p = pad_w(w3.T, H2P, OUTP).astype(compute_dtype)
    return (w1p, pad_v(b1, H1P), pad_v(g1, H1P), pad_v(be1, H1P),
            w2p, pad_v(b2, H2P), pad_v(g2, H2P), pad_v(be2, H2P),
            w3p, pad_v(b3, OUTP))


# ----------------------------------------------------------------------------
# Forward wrapper.
# ----------------------------------------------------------------------------
def mlp_forward(x, packed):
    """x: (B, 1, 28, 28) or (B, 784).  Returns (B, 10) float32."""
    cdt = packed[0].dtype
    x2d = x.reshape(-1, IN_DIM).astype(cdt)     # == x.view(-1, 784) (+ dtype cast)
    B = x2d.shape[0]

    # VMEM budget estimate with headroom (whole-batch-resident design).
    act_bytes = B * (IN_DIM * x2d.dtype.itemsize + (H1P + H2P + OUTP) * 4)
    w_bytes = sum(int(p.size) * p.dtype.itemsize for p in packed)
    vmem_limit = int(min(max(4 * (act_bytes + w_bytes), 16 * 2 ** 20), 48 * 2 ** 20))

    # TODO(synk): for very large B (v7x 64 MiB VMEM), switch to a batch-tiled
    # grid that accumulates BN sum / sum-of-squares in VMEM scratch across an
    # "arbitrary" axis (two-pass stats) instead of whole-batch residency.
    # TODO(synk): for tiny deployment batches (B~8), keep the ~1 MB of packed
    # weights resident across calls (cross-call prefetch) instead of re-DMAing.
    vmem = pl.BlockSpec(memory_space=pltpu.MemorySpace.VMEM)
    out_padded = pl.pallas_call(
        _mlp_kernel,
        out_shape=jax.ShapeDtypeStruct((B, OUTP), jnp.float32),
        in_specs=[vmem] * 11,
        out_specs=vmem,
        compiler_params=pltpu.CompilerParams(vmem_limit_bytes=vmem_limit),
    )(x2d, *packed)
    return out_padded[:, :OUT]


# ----------------------------------------------------------------------------
# Init + pure-JAX reference (for checking only).
# ----------------------------------------------------------------------------
def init_params(key, in_dim=IN_DIM, h1=H1, h2=H2, out_dim=OUT):
    ks = jax.random.split(key, 6)

    def linear_init(kw, kb, fan_in, fan_out):
        bound = 1.0 / jnp.sqrt(fan_in)          # PyTorch nn.Linear default init
        w = jax.random.uniform(kw, (fan_out, fan_in), jnp.float32, -bound, bound)
        b = jax.random.uniform(kb, (fan_out,), jnp.float32, -bound, bound)
        return w, b

    w1, b1 = linear_init(ks[0], ks[1], in_dim, h1)
    w2, b2 = linear_init(ks[2], ks[3], h1, h2)
    w3, b3 = linear_init(ks[4], ks[5], h2, out_dim)
    g1, be1 = jnp.ones((h1,), jnp.float32), jnp.zeros((h1,), jnp.float32)
    g2, be2 = jnp.ones((h2,), jnp.float32), jnp.zeros((h2,), jnp.float32)
    return (w1, b1, g1, be1, w2, b2, g2, be2, w3, b3)


def reference_forward(x, params, compute_dtype=jnp.float32):
    """Pure-JAX reference (training-mode BN); matmul operands in compute_dtype."""
    (w1, b1, g1, be1, w2, b2, g2, be2, w3, b3) = params

    def lin(h, w, b):
        return jnp.dot(h.astype(compute_dtype), w.T.astype(compute_dtype),
                       preferred_element_type=jnp.float32) + b

    def bn_relu(h, g, be):
        mu = h.mean(0)
        var = h.var(0)
        return jnp.maximum((h - mu) * jax.lax.rsqrt(var + _EPS) * g + be, 0.0)

    h = lin(x.reshape(-1, IN_DIM), w1, b1)
    h = bn_relu(h, g1, be1)
    h = lin(h, w2, b2)
    h = bn_relu(h, g2, be2)
    return lin(h, w3, b3)


if __name__ == "__main__":
    key = jax.random.PRNGKey(0)
    kx, kp = jax.random.split(key)

    B = 8
    x = jax.random.normal(kx, (B, 1, 28, 28), dtype=jnp.float32)  # NCHW like PyTorch
    params = init_params(kp)

    fwd = jax.jit(mlp_forward)

    # f32 MXU operands: tight check against the f32 reference (module semantics).
    out_f32 = jax.block_until_ready(fwd(x, pack_params(params, jnp.float32)))
    ref_f32 = reference_forward(x, params, jnp.float32)
    assert out_f32.shape == (B, 10)
    assert jnp.allclose(out_f32, ref_f32, atol=1e-4, rtol=1e-4)

    # bf16 MXU operands (perf mode for v6e/v7x, BN still f32): check against a
    # matching bf16-operand reference.
    out_bf16 = jax.block_until_ready(fwd(x, pack_params(params, jnp.bfloat16)))
    ref_bf16 = reference_forward(x, params, jnp.bfloat16)
    assert out_bf16.shape == (B, 10)
    assert jnp.allclose(out_bf16, ref_bf16, atol=5e-3, rtol=5e-3)

    print("KERNEL_OK")
</pallas_src>

<mosaic_0001>
module attributes {stable_mosaic.version = 11 : i64} {
  func.func @_mlp_kernel(%arg0: memref<8x784xf32, #tpu.memory_space<vmem>>, %arg1: memref<784x384xf32, #tpu.memory_space<vmem>>, %arg2: memref<1x384xf32, #tpu.memory_space<vmem>>, %arg3: memref<1x384xf32, #tpu.memory_space<vmem>>, %arg4: memref<1x384xf32, #tpu.memory_space<vmem>>, %arg5: memref<384x128xf32, #tpu.memory_space<vmem>>, %arg6: memref<1x128xf32, #tpu.memory_space<vmem>>, %arg7: memref<1x128xf32, #tpu.memory_space<vmem>>, %arg8: memref<1x128xf32, #tpu.memory_space<vmem>>, %arg9: memref<128x128xf32, #tpu.memory_space<vmem>>, %arg10: memref<1x128xf32, #tpu.memory_space<vmem>>, %arg11: memref<8x128xf32, #tpu.memory_space<vmem>>) attributes {dimension_semantics = [], scalar_prefetch = 0 : i64, scratch_operands = 0 : i64, tpu.core_type = #tpu.core_type<tc>} {
    %c0 = arith.constant 0 : index
    %c0_0 = arith.constant 0 : index
    %0 = vector.load %arg0[%c0, %c0_0] : memref<8x784xf32, #tpu.memory_space<vmem>>, vector<8x784xf32>
    %c0_1 = arith.constant 0 : index
    %c0_2 = arith.constant 0 : index
    %1 = vector.load %arg1[%c0_1, %c0_2] : memref<784x384xf32, #tpu.memory_space<vmem>>, vector<784x384xf32>
    %cst = arith.constant dense<0.000000e+00> : vector<8x384xf32>
    %2 = tpu.matmul %0, %1, %cst {dimension_numbers = #tpu.dot_dimension_numbers<[1], [0], [0], [1], [0, 0, 1, 1], [], []>} : vector<8x784xf32>, vector<784x384xf32>, vector<8x384xf32> -> vector<8x384xf32>
    %c0_3 = arith.constant 0 : index
    %c0_4 = arith.constant 0 : index
    %3 = vector.load %arg2[%c0_3, %c0_4] : memref<1x384xf32, #tpu.memory_space<vmem>>, vector<1x384xf32>
    %4 = vector.broadcast %3 : vector<1x384xf32> to vector<8x384xf32>
    %5 = arith.addf %2, %4 : vector<8x384xf32>
    %cst_5 = arith.constant dense<0.000000e+00> : vector<384xf32>
    %6 = vector.multi_reduction <add>, %5, %cst_5 [0] : vector<8x384xf32> to vector<384xf32>
    %7 = vector.shape_cast %6 : vector<384xf32> to vector<1x384xf32>
    %cst_6 = arith.constant 1.250000e-01 : f32
    %8 = vector.broadcast %cst_6 : f32 to vector<1x384xf32>
    %9 = arith.mulf %7, %8 : vector<1x384xf32>
    %10 = arith.mulf %5, %5 : vector<8x384xf32>
    %cst_7 = arith.constant dense<0.000000e+00> : vector<384xf32>
    %11 = vector.multi_reduction <add>, %10, %cst_7 [0] : vector<8x384xf32> to vector<384xf32>
    %12 = vector.shape_cast %11 : vector<384xf32> to vector<1x384xf32>
    %cst_8 = arith.constant 1.250000e-01 : f32
    %13 = vector.broadcast %cst_8 : f32 to vector<1x384xf32>
    %14 = arith.mulf %12, %13 : vector<1x384xf32>
    %15 = arith.mulf %9, %9 : vector<1x384xf32>
    %16 = arith.subf %14, %15 : vector<1x384xf32>
    %cst_9 = arith.constant 0.000000e+00 : f32
    %17 = vector.broadcast %cst_9 : f32 to vector<1x384xf32>
    %18 = arith.maximumf %16, %17 : vector<1x384xf32>
    %c0_10 = arith.constant 0 : index
    %c0_11 = arith.constant 0 : index
    %19 = vector.load %arg3[%c0_10, %c0_11] : memref<1x384xf32, #tpu.memory_space<vmem>>, vector<1x384xf32>
    %cst_12 = arith.constant 9.99999974E-6 : f32
    %20 = vector.broadcast %cst_12 : f32 to vector<1x384xf32>
    %21 = arith.addf %18, %20 : vector<1x384xf32>
    %22 = math.rsqrt %21 : vector<1x384xf32>
    %23 = arith.mulf %19, %22 : vector<1x384xf32>
    %c0_13 = arith.constant 0 : index
    %c0_14 = arith.constant 0 : index
    %24 = vector.load %arg4[%c0_13, %c0_14] : memref<1x384xf32, #tpu.memory_space<vmem>>, vector<1x384xf32>
    %25 = arith.mulf %9, %23 : vector<1x384xf32>
    %26 = arith.subf %24, %25 : vector<1x384xf32>
    %27 = vector.broadcast %23 : vector<1x384xf32> to vector<8x384xf32>
    %28 = arith.mulf %5, %27 : vector<8x384xf32>
    %29 = vector.broadcast %26 : vector<1x384xf32> to vector<8x384xf32>
    %30 = arith.addf %28, %29 : vector<8x384xf32>
    %cst_15 = arith.constant 0.000000e+00 : f32
    %31 = vector.broadcast %cst_15 : f32 to vector<8x384xf32>
    %32 = arith.maximumf %30, %31 : vector<8x384xf32>
    %c0_16 = arith.constant 0 : index
    %c0_17 = arith.constant 0 : index
    %33 = vector.load %arg5[%c0_16, %c0_17] : memref<384x128xf32, #tpu.memory_space<vmem>>, vector<384x128xf32>
    %cst_18 = arith.constant dense<0.000000e+00> : vector<8x128xf32>
    %34 = tpu.matmul %32, %33, %cst_18 {dimension_numbers = #tpu.dot_dimension_numbers<[1], [0], [0], [1], [0, 0, 1, 1], [], []>} : vector<8x384xf32>, vector<384x128xf32>, vector<8x128xf32> -> vector<8x128xf32>
    %c0_19 = arith.constant 0 : index
    %c0_20 = arith.constant 0 : index
    %35 = vector.load %arg6[%c0_19, %c0_20] : memref<1x128xf32, #tpu.memory_space<vmem>>, vector<1x128xf32>
    %36 = vector.broadcast %35 : vector<1x128xf32> to vector<8x128xf32>
    %37 = arith.addf %34, %36 : vector<8x128xf32>
    %cst_21 = arith.constant dense<0.000000e+00> : vector<128xf32>
    %38 = vector.multi_reduction <add>, %37, %cst_21 [0] : vector<8x128xf32> to vector<128xf32>
    %39 = vector.shape_cast %38 : vector<128xf32> to vector<1x128xf32>
    %cst_22 = arith.constant 1.250000e-01 : f32
    %40 = vector.broadcast %cst_22 : f32 to vector<1x128xf32>
    %41 = arith.mulf %39, %40 : vector<1x128xf32>
    %42 = arith.mulf %37, %37 : vector<8x128xf32>
    %cst_23 = arith.constant dense<0.000000e+00> : vector<128xf32>
    %43 = vector.multi_reduction <add>, %42, %cst_23 [0] : vector<8x128xf32> to vector<128xf32>
    %44 = vector.shape_cast %43 : vector<128xf32> to vector<1x128xf32>
    %cst_24 = arith.constant 1.250000e-01 : f32
    %45 = vector.broadcast %cst_24 : f32 to vector<1x128xf32>
    %46 = arith.mulf %44, %45 : vector<1x128xf32>
    %47 = arith.mulf %41, %41 : vector<1x128xf32>
    %48 = arith.subf %46, %47 : vector<1x128xf32>
    %cst_25 = arith.constant 0.000000e+00 : f32
    %49 = vector.broadcast %cst_25 : f32 to vector<1x128xf32>
    %50 = arith.maximumf %48, %49 : vector<1x128xf32>
    %c0_26 = arith.constant 0 : index
    %c0_27 = arith.constant 0 : index
    %51 = vector.load %arg7[%c0_26, %c0_27] : memref<1x128xf32, #tpu.memory_space<vmem>>, vector<1x128xf32>
    %cst_28 = arith.constant 9.99999974E-6 : f32
    %52 = vector.broadcast %cst_28 : f32 to vector<1x128xf32>
    %53 = arith.addf %50, %52 : vector<1x128xf32>
    %54 = math.rsqrt %53 : vector<1x128xf32>
    %55 = arith.mulf %51, %54 : vector<1x128xf32>
    %c0_29 = arith.constant 0 : index
    %c0_30 = arith.constant 0 : index
    %56 = vector.load %arg8[%c0_29, %c0_30] : memref<1x128xf32, #tpu.memory_space<vmem>>, vector<1x128xf32>
    %57 = arith.mulf %41, %55 : vector<1x128xf32>
    %58 = arith.subf %56, %57 : vector<1x128xf32>
    %59 = vector.broadcast %55 : vector<1x128xf32> to vector<8x128xf32>
    %60 = arith.mulf %37, %59 : vector<8x128xf32>
    %61 = vector.broadcast %58 : vector<1x128xf32> to vector<8x128xf32>
    %62 = arith.addf %60, %61 : vector<8x128xf32>
    %cst_31 = arith.constant 0.000000e+00 : f32
    %63 = vector.broadcast %cst_31 : f32 to vector<8x128xf32>
    %64 = arith.maximumf %62, %63 : vector<8x128xf32>
    %c0_32 = arith.constant 0 : index
    %c0_33 = arith.constant 0 : index
    %65 = vector.load %arg9[%c0_32, %c0_33] : memref<128x128xf32, #tpu.memory_space<vmem>>, vector<128x128xf32>
    %cst_34 = arith.constant dense<0.000000e+00> : vector<8x128xf32>
    %66 = tpu.matmul %64, %65, %cst_34 {dimension_numbers = #tpu.dot_dimension_numbers<[1], [0], [0], [1], [0, 0, 1, 1], [], []>} : vector<8x128xf32>, vector<128x128xf32>, vector<8x128xf32> -> vector<8x128xf32>
    %c0_35 = arith.constant 0 : index
    %c0_36 = arith.constant 0 : index
    %67 = vector.load %arg10[%c0_35, %c0_36] : memref<1x128xf32, #tpu.memory_space<vmem>>, vector<1x128xf32>
    %68 = vector.broadcast %67 : vector<1x128xf32> to vector<8x128xf32>
    %69 = arith.addf %66, %68 : vector<8x128xf32>
    %c0_37 = arith.constant 0 : index
    %c0_38 = arith.constant 0 : index
    %70 = vector.load %arg11[%c0_37, %c0_38] : memref<8x128xf32, #tpu.memory_space<vmem>>, vector<8x128xf32>
    tpu.vector_store %arg11[%c0_37, %c0_38], %69 {strides = array<i32>} : memref<8x128xf32, #tpu.memory_space<vmem>>, vector<8x128xf32>,
    return
  }
}

</mosaic_0001>

<bundles_post_ra>
// kernel: mlp_forward.1
= control target key start
LH: loop header
LB: loop body
LE: loop exit
PB: predicated region body
PF: predicated region fallthrough
CT: control target
= control target key end

     0   :  { %16 = vsyncpa [#allocation3], 0  ;;  %s2820_s0 = inlined_call_operand.vmem [shape: f32[8,784], index: 0, kind: input, shape index: {}]   ;;  %s2821_s1 = inlined_call_operand.hbm [shape: f32[784,384], index: 1, kind: input, shape index: {}]   ;;  %s2822_s2 = inlined_call_operand.hbm [shape: f32[1,384], index: 2, kind: input, shape index: {}]   ;;  %s2823_s3 = inlined_call_operand.hbm [shape: f32[1,384], index: 3, kind: input, shape index: {}]   ;;  %s2824_s4 = inlined_call_operand.hbm [shape: f32[1,384], index: 4, kind: input, shape index: {}]   ;;  %s2825_s5 = inlined_call_operand.hbm [shape: f32[384,128], index: 5, kind: input, shape index: {}]   ;;  %s2826_s6 = inlined_call_operand.hbm [shape: f32[1,128], index: 6, kind: input, shape index: {}]   ;;  %s2827_s7 = inlined_call_operand.hbm [shape: f32[1,128], index: 7, kind: input, shape index: {}]   ;;  %s2828_s8 = inlined_call_operand.hbm [shape: f32[1,128], index: 8, kind: input, shape index: {}]   ;;  %s2829_s9 = inlined_call_operand.hbm [shape: f32[128,128], index: 9, kind: input, shape index: {}]   ;;  %s2830_s10 = inlined_call_operand.hbm [shape: f32[1,128], index: 10, kind: input, shape index: {}]   ;;  %s2831_s11 = inlined_call_operand.hbm [shape: f32[8,128], index: 11, kind: output, shape index: {}]  }
   0x1   :  { %17 = vsyncpa [#allocation6], 0 }
   0x2   :  { %18 = vsyncpa [#allocation9], 0 }
   0x3   :  { %19 = vsyncpa [#allocation12], 0 }
   0x4   :  { %20 = vsyncpa [#allocation15], 0 }
   0x5   :  { %21 = vsyncpa [#allocation18], 0 }
   0x6   :  { %22 = vsyncpa [#allocation4], 0  ;;  %s2482_s17 = smov [#allocation5]   ;;  %s2483_s19 = smov [#allocation8]  }
   0x7   :  { %s43_s18 = sshll.u32 %s2482_s17, 4  ;;  %s63_s20 = sshll.u32 %s2483_s19, 4  ;;  %s44_s18 = int_to_ptr.vmem [resolvable:$true] %s43_s18  ;;  %s64_s20 = int_to_ptr.vmem [resolvable:$true] %s63_s20 }
   0x8   :  { %s2226_s23 = scalar_lea.hbm %s2822_s2, 48 }
   0x9   :  { %p2227_p0 = scmp.ne.s32.totalorder %s2822_s2, %s2226_s23  ;;  %p2230_p1 = scmp.lt.u32.totalorder %s2226_s23, %s2822_s2 }
   0xb   :  { %p2232_p2 = pnand %p2230_p1, %p2227_p0 }
   0xd   :  { %2235 = shalt.err (!%p2232_p2)
}
   0xe   :  { %s2236_s28 = scalar_lea.vmem %s44_s18, 48  ;;  %s2240_s29 = scalar_lea.vmem %s44_s18, 64 }
   0xf   :  { %p2237_p3 = scmp.ne.s32.totalorder %s44_s18, %s2236_s28  ;;  %p2241_p4 = scmp.lt.s32.totalorder %s44_s18, %s44_s18 }
  0x10   :  { %p2242_p5 = scmp.lt.s32.totalorder %s2240_s29, %s2236_s28 }
  0x12   :  { %p2243_p6 = por %p2242_p5, %p2241_p4 }
  0x14   :  { %p2244_p7 = pnand %p2243_p6, %p2237_p3 }
  0x16   :  { %2247 = shalt.err (!%p2244_p7)
}
  0x17   :  { %46 = dma.hbm_to_vmem [thread:$0]  %s2822_s2, 48, %s44_s18, [#allocation6]  }
  0x18   :  { %s2248_s15 = scalar_lea.hbm %s2824_s4, 48 }
  0x19   :  { %p2249_p8 = scmp.ne.s32.totalorder %s2824_s4, %s2248_s15  ;;  %p2252_p9 = scmp.lt.u32.totalorder %s2248_s15, %s2824_s4 }
  0x1b   :  { %p2254_p10 = pnand %p2252_p9, %p2249_p8 }
  0x1d   :  { %2257 = shalt.err (!%p2254_p10)
}
  0x1e   :  { %s2258_s22 = scalar_lea.vmem %s64_s20, 48  ;;  %s2262_s23 = scalar_lea.vmem %s64_s20, 64 }
  0x1f   :  { %p2259_p11 = scmp.ne.s32.totalorder %s64_s20, %s2258_s22  ;;  %p2263_p12 = scmp.lt.s32.totalorder %s64_s20, %s64_s20 }
  0x20   :  { %p2264_p13 = scmp.lt.s32.totalorder %s2262_s23, %s2258_s22 }
  0x22   :  { %p2265_p0 = por %p2264_p13, %p2263_p12 }
  0x24   :  { %p2266_p1 = pnand %p2265_p0, %p2259_p11 }
  0x26   :  { %2269 = shalt.err (!%p2266_p1)
}
  0x27   :  { %66 = dma.hbm_to_vmem [thread:$0]  %s2824_s4, 48, %s64_s20, [#allocation9]  }
  0x28   :  { %s2484_s24 = smov [#allocation11]   ;;  %s2485_s26 = smov [#allocation14]  }
  0x29   :  { %s85_s25 = sshll.u32 %s2484_s24, 4  ;;  %s105_s27 = sshll.u32 %s2485_s26, 4  ;;  %s86_s25 = int_to_ptr.vmem [resolvable:$true] %s85_s25  ;;  %s106_s27 = int_to_ptr.vmem [resolvable:$true] %s105_s27 }
  0x2a   :  { %s2270_s30 = scalar_lea.hbm %s2826_s6, 16 }
  0x2b   :  { %p2271_p2 = scmp.ne.s32.totalorder %s2826_s6, %s2270_s30  ;;  %p2274_p3 = scmp.lt.u32.totalorder %s2270_s30, %s2826_s6 }
  0x2d   :  { %p2276_p4 = pnand %p2274_p3, %p2271_p2 }
  0x2f   :  { %2279 = shalt.err (!%p2276_p4)
}
  0x30   :  { %s2280_s4 = scalar_lea.vmem %s86_s25, 16  ;;  %s2284_s20 = scalar_lea.vmem %s86_s25, 32 }
  0x31   :  { %p2281_p5 = scmp.ne.s32.totalorder %s86_s25, %s2280_s4  ;;  %p2285_p6 = scmp.lt.s32.totalorder %s86_s25, %s86_s25 }
  0x32   :  { %p2286_p7 = scmp.lt.s32.totalorder %s2284_s20, %s2280_s4 }
  0x34   :  { %p2287_p8 = por %p2286_p7, %p2285_p6 }
  0x36   :  { %p2288_p9 = pnand %p2287_p8, %p2281_p5 }
  0x38   :  { %2291 = shalt.err (!%p2288_p9)
}
  0x39   :  { %88 = dma.hbm_to_vmem [thread:$0]  %s2826_s6, 16, %s86_s25, [#allocation12]  }
  0x3a   :  { %s2292_s22 = scalar_lea.hbm %s2828_s8, 16 }
  0x3b   :  { %p2293_p10 = scmp.ne.s32.totalorder %s2828_s8, %s2292_s22  ;;  %p2296_p11 = scmp.lt.u32.totalorder %s2292_s22, %s2828_s8 }
  0x3d   :  { %p2298_p12 = pnand %p2296_p11, %p2293_p10 }
  0x3f   :  { %2301 = shalt.err (!%p2298_p12)
}
  0x40   :  { %s2302_s26 = scalar_lea.vmem %s106_s27, 16  ;;  %s2306_s28 = scalar_lea.vmem %s106_s27, 32 }
  0x41   :  { %p2303_p13 = scmp.ne.s32.totalorder %s106_s27, %s2302_s26  ;;  %p2307_p0 = scmp.lt.s32.totalorder %s106_s27, %s106_s27 }
  0x42   :  { %p2308_p1 = scmp.lt.s32.totalorder %s2306_s28, %s2302_s26 }
  0x44   :  { %p2309_p2 = por %p2308_p1, %p2307_p0 }
  0x46   :  { %p2310_p3 = pnand %p2309_p2, %p2303_p13 }
  0x48   :  { %2313 = shalt.err (!%p2310_p3)
}
  0x49   :  { %108 = dma.hbm_to_vmem [thread:$0]  %s2828_s8, 16, %s106_s27, [#allocation15]  }
  0x4a   :  { %s2486_s29 = smov [#allocation2]   ;;  %s2314_s14 = scalar_lea.hbm %s2821_s1, 37632 }
  0x4b   :  { %s30_s30 = sshll.u32 %s2486_s29, 4  ;;  %p2315_p4 = scmp.ne.s32.totalorder %s2821_s1, %s2314_s14  ;;  %s31_s30 = int_to_ptr.vmem [resolvable:$true] %s30_s30 }
  0x4c   :  { %p2318_p5 = scmp.lt.u32.totalorder %s2314_s14, %s2821_s1 }
  0x4e   :  { %p2320_p6 = pnand %p2318_p5, %p2315_p4 }
  0x50   :  { %2323 = shalt.err (!%p2320_p6)
}
  0x51   :  { %s2324_s17 = scalar_lea.vmem %s31_s30, 37632  ;;  %p2329_p8 = scmp.lt.s32.totalorder %s31_s30, %s31_s30 }
  0x52   :  { %p2325_p7 = scmp.ne.s32.totalorder %s31_s30, %s2324_s17  ;;  %p2330_p9 = scmp.lt.s32.totalorder %s2324_s17, %s2324_s17 }
  0x54   :  { %p2331_p10 = por %p2330_p9, %p2329_p8 }
  0x56   :  { %p2332_p11 = pnand %p2331_p10, %p2325_p7 }
  0x58   :  { %2335 = shalt.err (!%p2332_p11)
}
  0x59   :  { %s2487_s8 = smov 384   ;;  %s2488_s27 = smov 24  }
  0x5a   :  { %36 = dma.hbm_to_vmem [thread:$0]  %s2821_s1, 37632, %s31_s30, [#allocation3], %s2487_s8, %s2487_s8, %s2488_s27  }
  0x5b   :  { %s2489_s22 = smov [#allocation7]   ;;  %s2490_s2 = smov [#allocation10]  }
  0x5c   :  { %s53_s23 = sshll.u32 %s2489_s22, 4  ;;  %s72_s18 = sshll.u32 %s2490_s2, 4  ;;  %s54_s23 = int_to_ptr.vmem [resolvable:$true] %s53_s23  ;;  %s73_s18 = int_to_ptr.vmem [resolvable:$true] %s72_s18 }
  0x5d   :  { %s2336_s28 = scalar_lea.hbm %s2823_s3, 48 }
  0x5e   :  { %p2337_p12 = scmp.ne.s32.totalorder %s2823_s3, %s2336_s28  ;;  %p2340_p13 = scmp.lt.u32.totalorder %s2336_s28, %s2823_s3 }
  0x60   :  { %p2342_p0 = pnand %p2340_p13, %p2337_p12 }
  0x62   :  { %2345 = shalt.err (!%p2342_p0)
}
  0x63   :  { %s2346_s1 = scalar_lea.vmem %s54_s23, 48  ;;  %s2350_s30 = scalar_lea.vmem %s54_s23, 64 }
  0x64   :  { %p2347_p1 = scmp.ne.s32.totalorder %s54_s23, %s2346_s1  ;;  %p2351_p2 = scmp.lt.s32.totalorder %s54_s23, %s54_s23 }
  0x65   :  { %p2352_p3 = scmp.lt.s32.totalorder %s2350_s30, %s2346_s1 }
  0x67   :  { %p2353_p4 = por %p2352_p3, %p2351_p2 }
  0x69   :  { %p2354_p5 = pnand %p2353_p4, %p2347_p1 }
  0x6b   :  { %2357 = shalt.err (!%p2354_p5)
}
  0x6c   :  { %56 = dma.hbm_to_vmem [thread:$0]  %s2823_s3, 48, %s54_s23, [#allocation6]  }
  0x6d   :  { %s2358_s20 = scalar_lea.hbm %s2825_s5, 6144 }
  0x6e   :  { %p2359_p6 = scmp.ne.s32.totalorder %s2825_s5, %s2358_s20  ;;  %p2362_p7 = scmp.lt.u32.totalorder %s2358_s20, %s2825_s5 }
  0x70   :  { %p2364_p8 = pnand %p2362_p7, %p2359_p6 }
  0x72   :  { %2367 = shalt.err (!%p2364_p8)
}
  0x73   :  { %s2368_s19 = scalar_lea.vmem %s73_s18, 6144  ;;  %p2373_p10 = scmp.lt.s32.totalorder %s73_s18, %s73_s18 }
  0x74   :  { %p2369_p9 = scmp.ne.s32.totalorder %s73_s18, %s2368_s19  ;;  %p2374_p11 = scmp.lt.s32.totalorder %s2368_s19, %s2368_s19 }
  0x76   :  { %p2375_p12 = por %p2374_p11, %p2373_p10 }
  0x78   :  { %p2376_p13 = pnand %p2375_p12, %p2369_p9 }
  0x7a   :  { %2379 = shalt.err (!%p2376_p13)
}
  0x7b   :  { %s2491_s3 = smov 128   ;;  %s2492_s21 = smov 8  }
  0x7c   :  { %78 = dma.hbm_to_vmem [thread:$0]  %s2825_s5, 6144, %s73_s18, [#allocation9], %s2491_s3, %s2491_s3, %s2492_s21  }
  0x7d   :  { %s2493_s2 = smov [#allocation13]   ;;  %s2494_s26 = smov [#allocation16]  }
  0x7e   :  { %s95_s24 = sshll.u32 %s2493_s2, 4  ;;  %s114_s28 = sshll.u32 %s2494_s26, 4  ;;  %s96_s24 = int_to_ptr.vmem [resolvable:$true] %s95_s24  ;;  %s115_s28 = int_to_ptr.vmem [resolvable:$true] %s114_s28 }
  0x7f   :  { %s2380_s29 = scalar_lea.hbm %s2827_s7, 16 }
  0x80   :  { %p2381_p0 = scmp.ne.s32.totalorder %s2827_s7, %s2380_s29  ;;  %p2384_p1 = scmp.lt.u32.totalorder %s2380_s29, %s2827_s7 }
  0x82   :  { %p2386_p2 = pnand %p2384_p1, %p2381_p0 }
  0x84   :  { %2389 = shalt.err (!%p2386_p2)
}
  0x85   :  { %s2390_s5 = scalar_lea.vmem %s96_s24, 16  ;;  %s2394_s18 = scalar_lea.vmem %s96_s24, 32 }
  0x86   :  { %p2391_p3 = scmp.ne.s32.totalorder %s96_s24, %s2390_s5  ;;  %p2395_p4 = scmp.lt.s32.totalorder %s96_s24, %s96_s24 }
  0x87   :  { %p2396_p5 = scmp.lt.s32.totalorder %s2394_s18, %s2390_s5 }
  0x89   :  { %p2397_p6 = por %p2396_p5, %p2395_p4 }
  0x8b   :  { %p2398_p7 = pnand %p2397_p6, %p2391_p3 }
  0x8d   :  { %2401 = shalt.err (!%p2398_p7)
}
  0x8e   :  { %98 = dma.hbm_to_vmem [thread:$0]  %s2827_s7, 16, %s96_s24, [#allocation12]  }
  0x8f   :  { %s2402_s16 = scalar_lea.hbm %s2829_s9, 2048 }
  0x90   :  { %p2403_p8 = scmp.ne.s32.totalorder %s2829_s9, %s2402_s16  ;;  %p2406_p9 = scmp.lt.u32.totalorder %s2402_s16, %s2829_s9 }
  0x92   :  { %p2408_p10 = pnand %p2406_p9, %p2403_p8 }
  0x94   :  { %2411 = shalt.err (!%p2408_p10)
}
  0x95   :  { %s2412_s22 = scalar_lea.vmem %s115_s28, 2048  ;;  %p2417_p12 = scmp.lt.s32.totalorder %s115_s28, %s115_s28 }
  0x96   :  { %p2413_p11 = scmp.ne.s32.totalorder %s115_s28, %s2412_s22  ;;  %p2418_p13 = scmp.lt.s32.totalorder %s2412_s22, %s2412_s22 }
  0x98   :  { %p2419_p0 = por %p2418_p13, %p2417_p12 }
  0x9a   :  { %p2420_p1 = pnand %p2419_p0, %p2413_p11 }
  0x9c   :  { %2423 = shalt.err (!%p2420_p1)
}
  0x9d   :  { %120 = dma.hbm_to_vmem [thread:$0]  %s2829_s9, 2048, %s115_s28, [#allocation15], %s2491_s3, %s2491_s3, %s2492_s21  }
  0x9e   :  { %s2495_s2 = smov [#allocation17]   ;;  %s2424_s25 = scalar_lea.hbm %s2830_s10, 16 }
  0x9f   :  { %s127_s24 = sshll.u32 %s2495_s2, 4  ;;  %p2425_p2 = scmp.ne.s32.totalorder %s2830_s10, %s2424_s25  ;;  %s128_s24 = int_to_ptr.vmem [resolvable:$true] %s127_s24 }
  0xa0   :  { %p2428_p3 = scmp.lt.u32.totalorder %s2424_s25, %s2830_s10 }
  0xa2   :  { %p2430_p4 = pnand %p2428_p3, %p2425_p2 }
  0xa4   :  { %2433 = shalt.err (!%p2430_p4)
}
  0xa5   :  { %s2434_s13 = scalar_lea.vmem %s128_s24, 16  ;;  %s2438_s9 = scalar_lea.vmem %s128_s24, 32 }
  0xa6   :  { %p2435_p5 = scmp.ne.s32.totalorder %s128_s24, %s2434_s13  ;;  %p2439_p6 = scmp.lt.s32.totalorder %s128_s24, %s128_s24 }
  0xa7   :  { %p2440_p7 = scmp.lt.s32.totalorder %s2438_s9, %s2434_s13 }
  0xa9   :  { %p2441_p8 = por %p2440_p7, %p2439_p6 }
  0xab   :  { %p2442_p9 = pnand %p2441_p8, %p2435_p5 }
  0xad   :  { %2445 = shalt.err (!%p2442_p9)
}
  0xae   :  { %130 = dma.hbm_to_vmem [thread:$0]  %s2830_s10, 16, %s128_s24, [#allocation18]  }
  0xaf   :  { %2468 = dma.done.wait [#allocation3], 37632  }
  0xb0   :  { %2469 = vsyncadd [#allocation3], 4294929664 }
  0xb1   :  { %2470 = dma.done.wait [#allocation6], 96  }
  0xb2   :  { %2471 = vsyncadd [#allocation6], 4294967200 }
  0xb3   :  { %2472 = dma.done.wait [#allocation9], 6192  }
  0xb4   :  { %2473 = vsyncadd [#allocation9], 4294961104 }
  0xb5   :  { %2474 = dma.done.wait [#allocation12], 32  }
  0xb6   :  { %2475 = vsyncadd [#allocation12], 4294967264 }
  0xb7   :  { %2476 = dma.done.wait [#allocation15], 2064  }
  0xb8   :  { %2477 = vsyncadd [#allocation15], 4294965232 }
  0xb9   :  { %2478 = dma.done.wait [#allocation18], 16  }
  0xba   :  { %2479 = vsyncadd [#allocation18], 4294967280  ;;  %v169_v0 = vld [vmem:[#allocation2 + $0x8] sm:$0xff]  ;;  %v172_v1 = vld [vmem:[#allocation2 + $0x20] sm:$0xff]  ;;  %vm479_vm0 = vcmask 130048   ;;  %vm2497_vm1 = vmmov 0  }
  0xbb   :  { %v168_v2 = vld [vmem:[#allocation2] sm:$0xff]  ;;  %v1816_v3 = vpack.c.bf16 %v172_v1, %v169_v0  ;;  %v171_v4 = vld [vmem:[#allocation2 + $0x18] sm:$0xff]  ;;  %v178_v6 = vld [vmem:[#allocation2 + $0x50] sm:$0xff] }
  0xbc   :  { %v175_v5 = vld [vmem:[#allocation2 + $0x38] sm:$0xff]  ;;  %v1818_v7 = vpack.c.bf16 %v171_v4, %v168_v2  ;;  %v174_v9 = vld [vmem:[#allocation2 + $0x30] sm:$0xff]  ;;  %v177_v10 = vld [vmem:[#allocation2 + $0x48] sm:$0xff] }
  0xbd   :  { %v1820_v8 = vpack.c.bf16 %v178_v6, %v175_v5  ;;  %v181_v11 = vld [vmem:[#allocation2 + $0x68] sm:$0xff]  ;;  %1817 = vmatprep.subr.bf16.mxu0 %v1816_v3  ;;  %v184_v12 = vld [vmem:[#allocation2 + $0x80] sm:$0xff]  ;;  %v1822_v13 = vpack.c.bf16 %v177_v10, %v174_v9  ;;  %v183_v16 = vld [vmem:[#allocation2 + $0x78] sm:$0xff] }
  0xbe   :  { %1819 = vmatpush1.bf16.msra.mxu0 %v1818_v7  ;;  %v1824_v14 = vpack.c.bf16 %v184_v12, %v181_v11  ;;  %v180_v15 = vld [vmem:[#allocation2 + $0x60] sm:$0xff]  ;;  %v187_v17 = vld [vmem:[#allocation2 + $0x98] sm:$0xff]  ;;  %v190_v18 = vld [vmem:[#allocation2 + $0xb0] sm:$0xff] }
  0xbf   :  { %1821 = vmatprep.subr.bf16.mxu0 %v1820_v8  ;;  %v1826_v19 = vpack.c.bf16 %v183_v16, %v180_v15  ;;  %v1828_v20 = vpack.c.bf16 %v190_v18, %v187_v17  ;;  %v186_v21 = vld [vmem:[#allocation2 + $0x90] sm:$0xff]  ;;  %v189_v22 = vld [vmem:[#allocation2 + $0xa8] sm:$0xff]  ;;  %v196_v24 = vld [vmem:[#allocation2 + $0xe0] sm:$0xff] }
  0xc0   :  { %v193_v23 = vld [vmem:[#allocation2 + $0xc8] sm:$0xff]  ;;  %v1830_v25 = vpack.c.bf16 %v189_v22, %v186_v21  ;;  %v192_v26 = vld [vmem:[#allocation2 + $0xc0] sm:$0xff]  ;;  %v195_v27 = vld [vmem:[#allocation2 + $0xd8] sm:$0xff] }
  0xc1   :  { %v1832_v28 = vpack.c.bf16 %v196_v24, %v193_v23  ;;  %v199_v29 = vld [vmem:[#allocation2 + $0xf8] sm:$0xff]  ;;  %v218_v30 = vld [vmem:[#allocation2 + $0x190] sm:$0xff]  ;;  %v221_v31 = vld [vmem:[#allocation2 + $0x1a8] sm:$0xff]  ;;  %v1834_v37 = vpack.c.bf16 %v195_v27, %v192_v26 }
  0xc2   :  { %1823 = vmatpush1.bf16.msra.mxu0 %v1822_v13  ;;  %v202_v32 = vld [vmem:[#allocation2 + $0x110] sm:$0xff]  ;;  %v2012_v33 = vpack.c.bf16 %v221_v31, %v218_v30  ;;  %v173_v35 = vld [vmem:[#allocation2 + $0x28] sm:$0xff]  ;;  %v224_v38 = vld [vmem:[#allocation2 + $0x1c0] sm:$0xff] }
  0xc3   :  { %1825 = vmatprep.subr.bf16.mxu0 %v1824_v14  ;;  %v170_v34 = vld [vmem:[#allocation2 + $0x10] sm:$0xff]  ;;  %v227_v39 = vld [vmem:[#allocation2 + $0x1d8] sm:$0xff]  ;;  %v176_v40 = vld [vmem:[#allocation2 + $0x40] sm:$0xff]  ;;  %v1836_v41 = vpack.c.bf16 %v202_v32, %v199_v29 }
  0xc4   :  { %v2014_v36 = vpack.c.bf16 %v173_v35, %v170_v34  ;;  %2013 = vmatprep.subr.bf16.mxu1 %v2012_v33  ;;  %v198_v42 = vld [vmem:[#allocation2 + $0xf0] sm:$0xff]  ;;  %v201_v43 = vld [vmem:[#allocation2 + $0x108] sm:$0xff]  ;;  %v2016_v44 = vpack.c.bf16 %v227_v39, %v224_v38  ;;  %v179_v45 = vld [vmem:[#allocation2 + $0x58] sm:$0xff] }
  0xc5   :  { %v205_v46 = vld [vmem:[#allocation2 + $0x128] sm:$0xff]  ;;  %v208_v47 = vld [vmem:[#allocation2 + $0x140] sm:$0xff]  ;;  %v2018_v48 = vpack.c.bf16 %v179_v45, %v176_v40  ;;  %v230_v49 = vld [vmem:[#allocation2 + $0x1f0] sm:$0xff]  ;;  %v1838_v53 = vpack.c.bf16 %v201_v43, %v198_v42 }
  0xc6   :  { %1827 = vmatpush1.bf16.msra.mxu0 %v1826_v19  ;;  %2015 = vmatpush3.bf16.msra.mxu1 %v2014_v36  ;;  %v233_v50 = vld [vmem:[#allocation2 + $0x208] sm:$0xff]  ;;  %v182_v51 = vld [vmem:[#allocation2 + $0x70] sm:$0xff]  ;;  %v204_v54 = vld [vmem:[#allocation2 + $0x120] sm:$0xff]  ;;  %v1840_v57 = vpack.c.bf16 %v208_v47, %v205_v46 }
  0xc7   :  { %1829 = vmatprep.subr.bf16.mxu0 %v1828_v20  ;;  %2017 = vmatprep.subr.bf16.mxu1 %v2016_v44  ;;  %v185_v52 = vld [vmem:[#allocation2 + $0x88] sm:$0xff]  ;;  %v207_v55 = vld [vmem:[#allocation2 + $0x138] sm:$0xff]  ;;  %v2020_v56 = vpack.c.bf16 %v233_v50, %v230_v49  ;;  %v236_v60 = vld [vmem:[#allocation2 + $0x220] sm:$0xff] }
  0xc8   :  { %v211_v58 = vld [vmem:[#allocation2 + $0x158] sm:$0xff]  ;;  %v2022_v59 = vpack.c.bf16 %v185_v52, %v182_v51  ;;  %v214_v62 = vld [vmem:[#allocation2 + $0x170] sm:$0xff]  ;;  %v188_v0 = vld [vmem:[#allocation2 + $0xa0] sm:$0xff]  ;;  %v1842_v2 = vpack.c.bf16 %v207_v55, %v204_v54 }
  0xc9   :  { %v239_v61 = vld [vmem:[#allocation2 + $0x238] sm:$0xff]  ;;  %v242_v3 = vld [vmem:[#allocation2 + $0x250] sm:$0xff]  ;;  %v245_v4 = vld [vmem:[#allocation2 + $0x268] sm:$0xff]  ;;  %v1844_v5 = vpack.c.bf16 %v214_v62, %v211_v58 }
  0xca   :  { %1831 = vmatpush1.bf16.msra.mxu0 %v1830_v25  ;;  %2019 = vmatpush3.bf16.msra.mxu1 %v2018_v48  ;;  %v2024_v63 = vpack.c.bf16 %v239_v61, %v236_v60  ;;  %v191_v1 = vld [vmem:[#allocation2 + $0xb8] sm:$0xff]  ;;  %v210_v6 = vld [vmem:[#allocation2 + $0x150] sm:$0xff]  ;;  %v213_v7 = vld [vmem:[#allocation2 + $0x168] sm:$0xff]  ;;  %v2028_v11 = vpack.c.bf16 %v245_v4, %v242_v3 }
  0xcb   :  { %1833 = vmatprep.subr.bf16.mxu0 %v1832_v28  ;;  %2021 = vmatprep.subr.bf16.mxu1 %v2020_v56  ;;  %v217_v8 = vld [vmem:[#allocation2 + $0x188] sm:$0xff]  ;;  %v2026_v9 = vpack.c.bf16 %v191_v1, %v188_v0  ;;  %v220_v10 = vld [vmem:[#allocation2 + $0x1a0] sm:$0xff]  ;;  %v194_v12 = vld [vmem:[#allocation2 + $0xd0] sm:$0xff]  ;;  %v1846_v16 = vpack.c.bf16 %v213_v7, %v210_v6 }
  0xcc   :  { %v197_v13 = vld [vmem:[#allocation2 + $0xe8] sm:$0xff]  ;;  %v248_v14 = vld [vmem:[#allocation2 + $0x280] sm:$0xff]  ;;  %v251_v15 = vld [vmem:[#allocation2 + $0x298] sm:$0xff]  ;;  %v1848_v18 = vpack.c.bf16 %v220_v10, %v217_v8 }
  0xcd   :  { %v216_v17 = vld [vmem:[#allocation2 + $0x180] sm:$0xff]  ;;  %v219_v19 = vld [vmem:[#allocation2 + $0x198] sm:$0xff]  ;;  %v226_v21 = vld [vmem:[#allocation2 + $0x1d0] sm:$0xff]  ;;  %v2030_v22 = vpack.c.bf16 %v197_v13, %v194_v12  ;;  %v2032_v23 = vpack.c.bf16 %v251_v15, %v248_v14 }
  0xce   :  { %1835 = vmatpush1.bf16.msra.mxu0 %v1834_v37  ;;  %2023 = vmatpush3.bf16.msra.mxu1 %v2022_v59  ;;  %v223_v20 = vld [vmem:[#allocation2 + $0x1b8] sm:$0xff]  ;;  %v200_v24 = vld [vmem:[#allocation2 + $0x100] sm:$0xff]  ;;  %v162_v26 = vld [vmem:[%s2820_s0 + $0x8] sm:$0xff]  ;;  %v1850_v29 = vpack.c.bf16 %v219_v19, %v216_v17 }
  0xcf   :  { %1837 = vmatprep.subr.bf16.mxu0 %v1836_v41  ;;  %2025 = vmatprep.subr.bf16.mxu1 %v2024_v63  ;;  %v203_v25 = vld [vmem:[#allocation2 + $0x118] sm:$0xff]  ;;  %v254_v27 = vld [vmem:[#allocation2 + $0x2b0] sm:$0xff]  ;;  %v257_v28 = vld [vmem:[#allocation2 + $0x2c8] sm:$0xff]  ;;  %v1852_v30 = vpack.c.bf16 %v226_v21, %v223_v20 }
  0xd0   :  { %547 = vmatprep.mubr.f32.mxu0 %v162_v26  ;;  %831 = vmatprep.mubr.f32.mxu1 %v162_v26  ;;  %v222_v31 = vld [vmem:[#allocation2 + $0x1b0] sm:$0xff]  ;;  %v225_v32 = vld [vmem:[#allocation2 + $0x1c8] sm:$0xff]  ;;  %v2034_v34 = vpack.c.bf16 %v203_v25, %v200_v24  ;;  %v232_v35 = vld [vmem:[#allocation2 + $0x200] sm:$0xff]  ;;  %v2036_v36 = vpack.c.bf16 %v257_v28, %v254_v27 }
  0xd1   :  { %v229_v33 = vld [vmem:[#allocation2 + $0x1e8] sm:$0xff]  ;;  %v206_v37 = vld [vmem:[#allocation2 + $0x130] sm:$0xff]  ;;  %v260_v39 = vld [vmem:[#allocation2 + $0x2e0] sm:$0xff]  ;;  %v1854_v41 = vpack.c.bf16 %v225_v32, %v222_v31 }
  0xd2   :  { %1839 = vmatpush1.bf16.msra.mxu0 %v1838_v53  ;;  %2027 = vmatpush3.bf16.msra.mxu1 %v2026_v9  ;;  %v209_v38 = vld [vmem:[#allocation2 + $0x148] sm:$0xff]  ;;  %v263_v40 = vld [vmem:[#allocation2 + $0x2f8] sm:$0xff]  ;;  %v1856_v42 = vpack.c.bf16 %v232_v35, %v229_v33  ;;  %v228_v43 = vld [vmem:[#allocation2 + $0x1e0] sm:$0xff] }
  0xd3   :  { %1841 = vmatprep.subr.bf16.mxu0 %v1840_v57  ;;  %2029 = vmatprep.subr.bf16.mxu1 %v2028_v11  ;;  %v231_v44 = vld [vmem:[#allocation2 + $0x1f8] sm:$0xff]  ;;  %v2038_v46 = vpack.c.bf16 %v209_v38, %v206_v37  ;;  %v238_v47 = vld [vmem:[#allocation2 + $0x230] sm:$0xff]  ;;  %v2040_v48 = vpack.c.bf16 %v263_v40, %v260_v39  ;;  %v212_v49 = vld [vmem:[#allocation2 + $0x160] sm:$0xff] }
  0xd4   :  { %v235_v45 = vld [vmem:[#allocation2 + $0x218] sm:$0xff]  ;;  %v314_v51 = vld [vmem:[#allocation2 + $0x490] sm:$0xff]  ;;  %v317_v52 = vld [vmem:[#allocation2 + $0x4a8] sm:$0xff]  ;;  %v1858_v53 = vpack.c.bf16 %v231_v44, %v228_v43 }
  0xd5   :  { %v215_v50 = vld [vmem:[#allocation2 + $0x178] sm:$0xff]  ;;  %v1860_v54 = vpack.c.bf16 %v238_v47, %v235_v45  ;;  %v234_v55 = vld [vmem:[#allocation2 + $0x210] sm:$0xff]  ;;  %v237_v56 = vld [vmem:[#allocation2 + $0x228] sm:$0xff]  ;;  %v2044_v60 = vpack.c.bf16 %v317_v52, %v314_v51 }
  0xd6   :  { %1843 = vmatpush1.bf16.msra.mxu0 %v1842_v2  ;;  %2031 = vmatpush3.bf16.msra.mxu1 %v2030_v22  ;;  %v241_v57 = vld [vmem:[#allocation2 + $0x248] sm:$0xff]  ;;  %v2042_v58 = vpack.c.bf16 %v215_v50, %v212_v49  ;;  %v244_v59 = vld [vmem:[#allocation2 + $0x260] sm:$0xff]  ;;  %v266_v61 = vld [vmem:[#allocation2 + $0x310] sm:$0xff]  ;;  %v1862_v1 = vpack.c.bf16 %v237_v56, %v234_v55 }
  0xd7   :  { %1845 = vmatprep.subr.bf16.mxu0 %v1844_v5  ;;  %2033 = vmatprep.subr.bf16.mxu1 %v2032_v23  ;;  %v269_v62 = vld [vmem:[#allocation2 + $0x328] sm:$0xff]  ;;  %v320_v63 = vld [vmem:[#allocation2 + $0x4c0] sm:$0xff]  ;;  %v323_v0 = vld [vmem:[#allocation2 + $0x4d8] sm:$0xff]  ;;  %v1864_v2 = vpack.c.bf16 %v244_v59, %v241_v57 }
  0xd8   :  { %v240_v3 = vld [vmem:[#allocation2 + $0x240] sm:$0xff]  ;;  %v243_v4 = vld [vmem:[#allocation2 + $0x258] sm:$0xff]  ;;  %v2046_v6 = vpack.c.bf16 %v269_v62, %v266_v61  ;;  %v250_v7 = vld [vmem:[#allocation2 + $0x290] sm:$0xff]  ;;  %v2048_v8 = vpack.c.bf16 %v323_v0, %v320_v63 }
  0xd9   :  { %v247_v5 = vld [vmem:[#allocation2 + $0x278] sm:$0xff]  ;;  %v272_v9 = vld [vmem:[#allocation2 + $0x340] sm:$0xff]  ;;  %v326_v12 = vld [vmem:[#allocation2 + $0x4f0] sm:$0xff]  ;;  %v1866_v14 = vpack.c.bf16 %v243_v4, %v240_v3 }
  0xda   :  { %1847 = vmatpush1.bf16.msra.mxu0 %v1846_v16  ;;  %2035 = vmatpush3.bf16.msra.mxu1 %v2034_v34  ;;  %v275_v10 = vld [vmem:[#allocation2 + $0x358] sm:$0xff]  ;;  %v2693_v11 = vld [vmem:[%s2820_s0] sm:$0xff]  ;;  %v329_v13 = vld [vmem:[#allocation2 + $0x508] sm:$0xff]  ;;  %v1868_v15 = vpack.c.bf16 %v250_v7, %v247_v5 }
  0xdb   :  { %1849 = vmatprep.subr.bf16.mxu0 %v1848_v18  ;;  %2037 = vmatprep.subr.bf16.mxu1 %v2036_v36  ;;  %v246_v16 = vld [vmem:[#allocation2 + $0x270] sm:$0xff]  ;;  %v249_v17 = vld [vmem:[#allocation2 + $0x288] sm:$0xff]  ;;  %v2050_v19 = vpack.c.bf16 %v275_v10, %v272_v9  ;;  %v256_v20 = vld [vmem:[#allocation2 + $0x2c0] sm:$0xff]  ;;  %v2052_v21 = vpack.c.bf16 %v329_v13, %v326_v12 }
  0xdc   :  { %v253_v18 = vld [vmem:[#allocation2 + $0x2a8] sm:$0xff]  ;;  %v278_v22 = vld [vmem:[#allocation2 + $0x370] sm:$0xff]  ;;  %v332_v24 = vld [vmem:[#allocation2 + $0x520] sm:$0xff]  ;;  %v1870_v26 = vpack.c.bf16 %v249_v17, %v246_v16 }
  0xdd   :  { %v281_v23 = vld [vmem:[#allocation2 + $0x388] sm:$0xff]  ;;  %v335_v25 = vld [vmem:[#allocation2 + $0x538] sm:$0xff]  ;;  %v1872_v27 = vpack.c.bf16 %v256_v20, %v253_v18  ;;  %v252_v28 = vld [vmem:[#allocation2 + $0x2a0] sm:$0xff] }
  0xde   :  { %1851 = vmatpush1.bf16.msra.mxu0 %v1850_v29  ;;  %2039 = vmatpush3.bf16.msra.mxu1 %v2038_v46  ;;  %v255_v29 = vld [vmem:[#allocation2 + $0x2b8] sm:$0xff]  ;;  %v2054_v31 = vpack.c.bf16 %v281_v23, %v278_v22  ;;  %v262_v32 = vld [vmem:[#allocation2 + $0x2f0] sm:$0xff]  ;;  %v2056_v33 = vpack.c.bf16 %v335_v25, %v332_v24  ;;  %v284_v34 = vld [vmem:[#allocation2 + $0x3a0] sm:$0xff] }
  0xdf   :  { %1853 = vmatprep.subr.bf16.mxu0 %v1852_v30  ;;  %2041 = vmatprep.subr.bf16.mxu1 %v2040_v48  ;;  %v259_v30 = vld [vmem:[#allocation2 + $0x2d8] sm:$0xff]  ;;  %v338_v36 = vld [vmem:[#allocation2 + $0x550] sm:$0xff]  ;;  %v341_v37 = vld [vmem:[#allocation2 + $0x568] sm:$0xff]  ;;  %v1874_v38 = vpack.c.bf16 %v255_v29, %v252_v28 }
  0xe0   :  { %v287_v35 = vld [vmem:[#allocation2 + $0x3b8] sm:$0xff]  ;;  %v1876_v40 = vpack.c.bf16 %v262_v32, %v259_v30  ;;  %v265_v43 = vld [vmem:[#allocation2 + $0x308] sm:$0xff]  ;;  %v268_v45 = vld [vmem:[#allocation2 + $0x320] sm:$0xff]  ;;  %v2060_v46 = vpack.c.bf16 %v341_v37, %v338_v36 }
  0xe1   :  { %v164_v39 = vld [vmem:[%s2820_s0 + $0x18] sm:$0xff]  ;;  %v2058_v44 = vpack.c.bf16 %v287_v35, %v284_v34  ;;  %v290_v47 = vld [vmem:[#allocation2 + $0x3d0] sm:$0xff]  ;;  %v293_v48 = vld [vmem:[#allocation2 + $0x3e8] sm:$0xff]  ;;  %v1880_v52 = vpack.c.bf16 %v268_v45, %v265_v43 }
  0xe2   :  { %1855 = vmatpush1.bf16.msra.mxu0 %v1854_v41  ;;  %2043 = vmatpush3.bf16.msra.mxu1 %v2042_v58  ;;  %v258_v41 = vld [vmem:[#allocation2 + $0x2d0] sm:$0xff]  ;;  %v344_v49 = vld [vmem:[#allocation2 + $0x580] sm:$0xff]  ;;  %v347_v50 = vld [vmem:[#allocation2 + $0x598] sm:$0xff]  ;;  %v2062_v56 = vpack.c.bf16 %v293_v48, %v290_v47 }
  0xe3   :  { %1857 = vmatprep.subr.bf16.mxu0 %v1856_v42  ;;  %2045 = vmatprep.subr.bf16.mxu1 %v2044_v60  ;;  %v261_v42 = vld [vmem:[#allocation2 + $0x2e8] sm:$0xff]  ;;  %v271_v55 = vld [vmem:[#allocation2 + $0x338] sm:$0xff]  ;;  %v274_v57 = vld [vmem:[#allocation2 + $0x350] sm:$0xff]  ;;  %v2064_v58 = vpack.c.bf16 %v347_v50, %v344_v49 }
  0xe4   :  { %v1878_v51 = vpack.c.bf16 %v261_v42, %v258_v41  ;;  %v296_v59 = vld [vmem:[#allocation2 + $0x400] sm:$0xff]  ;;  %v299_v60 = vld [vmem:[#allocation2 + $0x418] sm:$0xff]  ;;  %v350_v61 = vld [vmem:[#allocation2 + $0x5b0] sm:$0xff]  ;;  %v1884_v0 = vpack.c.bf16 %v274_v57, %v271_v55 }
  0xe5   :  { %832 = vmatmul.mubr.f32.vlgmr.msra.gmra.mrb[0].mxu1 %v2693_v11  ;;  %v353_v62 = vld [vmem:[#allocation2 + $0x5c8] sm:$0xff]  ;;  %v2066_v4 = vpack.c.bf16 %v299_v60, %v296_v59  ;;  %v280_v5 = vld [vmem:[#allocation2 + $0x380] sm:$0xff]  ;;  %v302_v7 = vld [vmem:[#allocation2 + $0x430] sm:$0xff] }
  0xe6   :  { %1859 = vmatpush1.bf16.msra.mxu0 %v1858_v53  ;;  %2047 = vmatpush3.bf16.msra.mxu1 %v2046_v6  ;;  %v264_v53 = vld [vmem:[#allocation2 + $0x300] sm:$0xff]  ;;  %v277_v3 = vld [vmem:[#allocation2 + $0x368] sm:$0xff]  ;;  %v2068_v6 = vpack.c.bf16 %v353_v62, %v350_v61  ;;  %v359_v10 = vld [vmem:[#allocation2 + $0x5f8] sm:$0xff] }
  0xe7   :  { %1861 = vmatprep.subr.bf16.mxu0 %v1860_v54  ;;  %2049 = vmatprep.subr.bf16.mxu1 %v2048_v8  ;;  %v267_v54 = vld [vmem:[#allocation2 + $0x318] sm:$0xff]  ;;  %v305_v8 = vld [vmem:[#allocation2 + $0x448] sm:$0xff]  ;;  %v356_v9 = vld [vmem:[#allocation2 + $0x5e0] sm:$0xff]  ;;  %v1888_v13 = vpack.c.bf16 %v280_v5, %v277_v3 }
  0xe8   :  { %901 = vmatprep.mubr.f32.mxu1 %v164_v39  ;;  %v1882_v63 = vpack.c.bf16 %v267_v54, %v264_v53  ;;  %v283_v16 = vld [vmem:[#allocation2 + $0x398] sm:$0xff]  ;;  %v2070_v17 = vpack.c.bf16 %v305_v8, %v302_v7  ;;  %v286_v18 = vld [vmem:[#allocation2 + $0x3b0] sm:$0xff]  ;;  %v308_v20 = vld [vmem:[#allocation2 + $0x460] sm:$0xff] }
  0xe9   :  { %v410_v22 = vld [vmem:[#allocation2 + $0x790] sm:$0xff]  ;;  %v413_v23 = vld [vmem:[#allocation2 + $0x7a8] sm:$0xff]  ;;  %v1892_v24 = vpack.c.bf16 %v286_v18, %v283_v16  ;;  %v292_v29 = vld [vmem:[#allocation2 + $0x3e0] sm:$0xff] }
  0xea   :  { %1863 = vmatpush1.bf16.msra.mxu0 %v1862_v1  ;;  %2051 = vmatpush3.bf16.msra.mxu1 %v2050_v19  ;;  %v270_v1 = vld [vmem:[#allocation2 + $0x330] sm:$0xff]  ;;  %v2072_v19 = vpack.c.bf16 %v359_v10, %v356_v9  ;;  %v2076_v30 = vpack.c.bf16 %v413_v23, %v410_v22  ;;  %v365_v32 = vld [vmem:[#allocation2 + $0x628] sm:$0xff]  ;;  %v419_v34 = vld [vmem:[#allocation2 + $0x7d8] sm:$0xff] }
  0xeb   :  { %1865 = vmatprep.subr.bf16.mxu0 %v1864_v2  ;;  %2053 = vmatprep.subr.bf16.mxu1 %v2052_v21  ;;  %v273_v2 = vld [vmem:[#allocation2 + $0x348] sm:$0xff]  ;;  %v311_v21 = vld [vmem:[#allocation2 + $0x478] sm:$0xff]  ;;  %v282_v25 = vld [vmem:[#allocation2 + $0x390] sm:$0xff] }
  0xec   :  { %v1886_v12 = vpack.c.bf16 %v273_v2, %v270_v1  ;;  %v2074_v28 = vpack.c.bf16 %v311_v21, %v308_v20  ;;  %v288_v36 = vld [vmem:[#allocation2 + $0x3c0] sm:$0xff]  ;;  %v298_v42 = vld [vmem:[#allocation2 + $0x410] sm:$0xff]  ;;  %v371_v45 = vld [vmem:[#allocation2 + $0x658] sm:$0xff] }
  0xed   :  { %v425_v47 = vld [vmem:[#allocation2 + $0x808] sm:$0xff]  ;;  %v304_v55 = vld [vmem:[#allocation2 + $0x440] sm:$0xff]  ;;  %v374_v57 = vld [vmem:[#allocation2 + $0x670] sm:$0xff] }
  0xee   :  { %1867 = vmatpush1.bf16.msra.mxu0 %v1866_v14  ;;  %2055 = vmatpush3.bf16.msra.mxu1 %v2054_v31  ;;  %v276_v14 = vld [vmem:[#allocation2 + $0x360] sm:$0xff]  ;;  %v362_v31 = vld [vmem:[#allocation2 + $0x610] sm:$0xff]  ;;  %v2708_v48 = vld [vmem:[%s2820_s0 + $0x28] sm:$0xff] }
  0xef   :  { %1869 = vmatprep.subr.bf16.mxu0 %v1868_v15  ;;  %2057 = vmatprep.subr.bf16.mxu1 %v2056_v33  ;;  %v279_v15 = vld [vmem:[#allocation2 + $0x378] sm:$0xff]  ;;  %v416_v33 = vld [vmem:[#allocation2 + $0x7c0] sm:$0xff]  ;;  %v2078_v41 = vpack.c.bf16 %v365_v32, %v362_v31  ;;  %v301_v53 = vld [vmem:[#allocation2 + $0x428] sm:$0xff] }
  0xf0   :  { %v2080_v43 = vpack.c.bf16 %v419_v34, %v416_v33  ;;  %v428_v59 = vld [vmem:[#allocation2 + $0x820] sm:$0xff]  ;;  %v431_v60 = vld [vmem:[#allocation2 + $0x838] sm:$0xff]  ;;  %v1904_v62 = vpack.c.bf16 %v304_v55, %v301_v53  ;;  %v310_v3 = vld [vmem:[#allocation2 + $0x470] sm:$0xff] }
  0xf1   :  { %v307_v1 = vld [vmem:[#allocation2 + $0x458] sm:$0xff]  ;;  %v380_v5 = vld [vmem:[#allocation2 + $0x6a0] sm:$0xff]  ;;  %v434_v7 = vld [vmem:[#allocation2 + $0x850] sm:$0xff] }
  0xf2   :  { %1871 = vmatpush1.bf16.msra.mxu0 %v1870_v26  ;;  %2059 = vmatpush3.bf16.msra.mxu1 %v2058_v44  ;;  %v285_v26 = vld [vmem:[#allocation2 + $0x3a8] sm:$0xff]  ;;  %v368_v44 = vld [vmem:[#allocation2 + $0x640] sm:$0xff]  ;;  %v1908_v10 = vpack.c.bf16 %v310_v3, %v307_v1  ;;  %v386_v18 = vld [vmem:[#allocation2 + $0x6d0] sm:$0xff] }
  0xf3   :  { %1873 = vmatprep.subr.bf16.mxu0 %v1872_v27  ;;  %2061 = vmatprep.subr.bf16.mxu1 %v2060_v46  ;;  %v289_v27 = vld [vmem:[#allocation2 + $0x3c8] sm:$0xff]  ;;  %v1894_v35 = vpack.c.bf16 %v285_v26, %v282_v25  ;;  %v422_v46 = vld [vmem:[#allocation2 + $0x7f0] sm:$0xff]  ;;  %v2082_v54 = vpack.c.bf16 %v371_v45, %v368_v44  ;;  %v316_v16 = vld [vmem:[#allocation2 + $0x4a0] sm:$0xff] }
  0xf4   :  { %v1896_v37 = vpack.c.bf16 %v292_v29, %v289_v27  ;;  %v437_v8 = vld [vmem:[#allocation2 + $0x868] sm:$0xff]  ;;  %v440_v20 = vld [vmem:[#allocation2 + $0x880] sm:$0xff]  ;;  %v443_v21 = vld [vmem:[#allocation2 + $0x898] sm:$0xff] }
  0xf5   :  { %v319_v25 = vld [vmem:[#allocation2 + $0x4b8] sm:$0xff]  ;;  %v322_v27 = vld [vmem:[#allocation2 + $0x4d0] sm:$0xff]  ;;  %v392_v29 = vld [vmem:[#allocation2 + $0x700] sm:$0xff] }
  0xf6   :  { %1875 = vmatpush1.bf16.msra.mxu0 %v1874_v38  ;;  %2063 = vmatpush3.bf16.msra.mxu1 %v2062_v56  ;;  %v291_v38 = vld [vmem:[#allocation2 + $0x3d8] sm:$0xff]  ;;  %v2084_v56 = vpack.c.bf16 %v425_v47, %v422_v46  ;;  %v446_v31 = vld [vmem:[#allocation2 + $0x8b0] sm:$0xff]  ;;  %v449_v32 = vld [vmem:[#allocation2 + $0x8c8] sm:$0xff]  ;;  %v1916_v34 = vpack.c.bf16 %v322_v27, %v319_v25 }
  0xf7   :  { %1877 = vmatprep.subr.bf16.mxu0 %v1876_v40  ;;  %2065 = vmatprep.subr.bf16.mxu1 %v2064_v58  ;;  %v2703_v40 = vld [vmem:[%s2820_s0 + $0x10] sm:$0xff]  ;;  %v1898_v49 = vpack.c.bf16 %v291_v38, %v288_v36  ;;  %v377_v58 = vld [vmem:[#allocation2 + $0x688] sm:$0xff]  ;;  %v452_v44 = vld [vmem:[#allocation2 + $0x8e0] sm:$0xff] }
  0xf8   :  { %v2086_v2 = vpack.c.bf16 %v377_v58, %v374_v57  ;;  %v321_v36 = vld [vmem:[#allocation2 + $0x4c8] sm:$0xff]  ;;  %v455_v45 = vld [vmem:[#allocation2 + $0x8f8] sm:$0xff]  ;;  %v334_v53 = vld [vmem:[#allocation2 + $0x530] sm:$0xff] }
  0xf9   :  { %v404_v55 = vld [vmem:[#allocation2 + $0x760] sm:$0xff]  ;;  %v461_v1 = vld [vmem:[#allocation2 + $0x928] sm:$0xff]  ;;  %v354_v27 = vld [vmem:[#allocation2 + $0x5d0] sm:$0xff] }
  0xfa   :  { %1879 = vmatpush1.bf16.msra.mxu0 %v1878_v51  ;;  %2067 = vmatpush3.bf16.msra.mxu1 %v2066_v4  ;;  %v294_v51 = vld [vmem:[#allocation2 + $0x3f0] sm:$0xff]  ;;  %v2088_v4 = vpack.c.bf16 %v431_v60, %v428_v59  ;;  %v333_v60 = vld [vmem:[#allocation2 + $0x528] sm:$0xff] }
  0xfb   :  { %1881 = vmatprep.subr.bf16.mxu0 %v1880_v52  ;;  %2069 = vmatprep.subr.bf16.mxu1 %v2068_v6  ;;  %v297_v52 = vld [vmem:[#allocation2 + $0x408] sm:$0xff]  ;;  %v383_v6 = vld [vmem:[#allocation2 + $0x6b8] sm:$0xff]  ;;  %v330_v59 = vld [vmem:[#allocation2 + $0x510] sm:$0xff] }
  0xfc   :  { %v1902_v61 = vpack.c.bf16 %v297_v52, %v294_v51  ;;  %v331_v51 = vld [vmem:[#allocation2 + $0x518] sm:$0xff] }
  0xfd   :  { %548 = vmatmul.mubr.f32.vlgmr.msra.gmra.mrb[0].mxu0 %v2693_v11  ;;  %v1890_v11 = vpack.c.bf16 %v279_v15, %v276_v14  ;;  %v313_v14 = vld [vmem:[#allocation2 + $0x488] sm:$0xff]  ;;  %v2090_v15 = vpack.c.bf16 %v383_v6, %v380_v5  ;;  %v1924_v58 = vpack.c.bf16 %v334_v53, %v331_v51  ;;  %v339_v5 = vld [vmem:[#allocation2 + $0x558] sm:$0xff]  ;;  %v2715_v6 = vld [vmem:[%s2820_s0 + $0x20] sm:$0xff] }
  0xfe   :  { %1883 = vmatpush1.bf16.msra.mxu0 %v1882_v63  ;;  %618 = vmatprep.mubr.f32.mxu0 %v164_v39  ;;  %v295_v39 = vld [vmem:[#allocation2 + $0x3f8] sm:$0xff]  ;;  %v300_v63 = vld [vmem:[#allocation2 + $0x420] sm:$0xff]  ;;  %v1912_v23 = vpack.c.bf16 %v316_v16, %v313_v14  ;;  %v342_v14 = vld [vmem:[#allocation2 + $0x570] sm:$0xff] }
  0xff   :  { %1885 = vmatprep.subr.bf16.mxu0 %v1884_v0  ;;  %2071 = vmatpush3.bf16.msra.mxu1 %v2070_v17  ;;  %v1900_v50 = vpack.c.bf16 %v298_v42, %v295_v39  ;;  %v303_v0 = vld [vmem:[#allocation2 + $0x438] sm:$0xff]  ;;  %v2092_v17 = vpack.c.bf16 %v437_v8, %v434_v7  ;;  %v328_v39 = vld [vmem:[#allocation2 + $0x500] sm:$0xff]  ;;  %v398_v42 = vld [vmem:[#allocation2 + $0x730] sm:$0xff] }
 0x100   :  { %2073 = vmatprep.subr.bf16.mxu1 %v2072_v19  ;;  %v1906_v9 = vpack.c.bf16 %v303_v0, %v300_v63  ;;  %v389_v19 = vld [vmem:[#allocation2 + $0x6e8] sm:$0xff]  ;;  %v340_v63 = vld [vmem:[#allocation2 + $0x560] sm:$0xff]  ;;  %v458_v0 = vld [vmem:[#allocation2 + $0x910] sm:$0xff] }
 0x101   :  { %v2094_v26 = vpack.c.bf16 %v389_v19, %v386_v18  ;;  %v2109_v7 = vpack.c.bf16 %v461_v1, %v458_v0  ;;  %v343_v8 = vld [vmem:[#allocation2 + $0x578] sm:$0xff]  ;;  %v2722_v16 = vld [vmem:[%s2820_s0 + $0x30] sm:$0xff]  ;;  %v352_v18 = vld [vmem:[#allocation2 + $0x5c0] sm:$0xff]  ;;  %v2498_v19 = vmov 0.0   ;;  %s2500_s0 = smov [#allocation19]  }
 0x102   :  { %1887 = vmatpush1.bf16.msra.mxu0 %v1886_v12  ;;  %v306_v12 = vld [vmem:[#allocation2 + $0x450] sm:$0xff]  ;;  %v393_v0 = vld [vmem:[#allocation2 + $0x708] sm:$0xff]  ;;  %s1544_s7 = sshll.u32 %s2500_s0, 4  ;;  %s1545_s7 = int_to_ptr.vmem [resolvable:$true] %s1544_s7 }
 0x103   :  { %1889 = vmatprep.subr.bf16.mxu0 %v1888_v13  ;;  %2075 = vmatpush3.bf16.msra.mxu1 %v2074_v28  ;;  %v309_v13 = vld [vmem:[#allocation2 + $0x468] sm:$0xff]  ;;  %v2096_v28 = vpack.c.bf16 %v443_v21, %v440_v20  ;;  %v378_v53 = vld [vmem:[#allocation2 + $0x690] sm:$0xff]  ;;  %s2446_s23 = scalar_lea.vmem %s1545_s7, 128  ;;  %p2451_p11 = scmp.lt.s32.totalorder %s1545_s7, %s1545_s7 }
 0x104   :  { %2077 = vmatprep.subr.bf16.mxu1 %v2076_v30  ;;  %v1910_v22 = vpack.c.bf16 %v309_v13, %v306_v12  ;;  %v395_v30 = vld [vmem:[#allocation2 + $0x718] sm:$0xff]  ;;  %v397_v1 = vld [vmem:[#allocation2 + $0x728] sm:$0xff]  ;;  %p2447_p10 = scmp.ne.s32.totalorder %s1545_s7, %s2446_s23  ;;  %p2452_p12 = scmp.lt.s32.totalorder %s2446_s23, %s2446_s23 }
 0x105   :  { %v2098_v38 = vpack.c.bf16 %v395_v30, %v392_v29  ;;  %v361_v29 = vld [vmem:[#allocation2 + $0x608] sm:$0xff]  ;;  %v364_v30 = vld [vmem:[#allocation2 + $0x620] sm:$0xff] }
 0x106   :  { %1891 = vmatpush1.bf16.msra.mxu0 %v1890_v11  ;;  %902 = vmatmul.mubr.f32.vlgmr.msra.gmra.mrb[2].mxu1 %v2703_v40  ;;  %v312_v11 = vld [vmem:[#allocation2 + $0x480] sm:$0xff]  ;;  %p2453_p13 = por %p2452_p12, %p2451_p11 }
 0x107   :  { %1893 = vmatprep.subr.bf16.mxu0 %v1892_v24  ;;  %2079 = vmatpush3.bf16.msra.mxu1 %v2078_v41  ;;  %v315_v24 = vld [vmem:[#allocation2 + $0x498] sm:$0xff]  ;;  %v2100_v41 = vpack.c.bf16 %v449_v32, %v446_v31  ;;  %v1944_v32 = vpack.c.bf16 %v364_v30, %v361_v29  ;;  %v421_v29 = vld [vmem:[#allocation2 + $0x7e8] sm:$0xff]  ;;  %v424_v30 = vld [vmem:[#allocation2 + $0x800] sm:$0xff] }
 0x108   :  { %2081 = vmatprep.subr.bf16.mxu1 %v2080_v43  ;;  %971 = vmatprep.mubr.f32.mxu1 %v2708_v48  ;;  %v1914_v33 = vpack.c.bf16 %v315_v24, %v312_v11  ;;  %v401_v43 = vld [vmem:[#allocation2 + $0x748] sm:$0xff]  ;;  %v355_v11 = vld [vmem:[#allocation2 + $0x5d8] sm:$0xff]  ;;  %v358_v24 = vld [vmem:[#allocation2 + $0x5f0] sm:$0xff]  ;;  %p2454_p0 = pnand %p2453_p13, %p2447_p10 }
 0x109   :  { %v2102_v52 = vpack.c.bf16 %v401_v43, %v398_v42  ;;  %v373_v42 = vld [vmem:[#allocation2 + $0x668] sm:$0xff]  ;;  %v376_v43 = vld [vmem:[#allocation2 + $0x680] sm:$0xff] }
 0x10a   :  { %1895 = vmatpush1.bf16.msra.mxu0 %v1894_v35  ;;  %v318_v35 = vld [vmem:[#allocation2 + $0x4b0] sm:$0xff] }
 0x10b   :  { %1897 = vmatprep.subr.bf16.mxu0 %v1896_v37  ;;  %2083 = vmatpush3.bf16.msra.mxu1 %v2082_v54  ;;  %v325_v37 = vld [vmem:[#allocation2 + $0x4e8] sm:$0xff]  ;;  %v1918_v46 = vpack.c.bf16 %v321_v36, %v318_v35  ;;  %v2104_v54 = vpack.c.bf16 %v455_v45, %v452_v44  ;;  %v367_v35 = vld [vmem:[#allocation2 + $0x638] sm:$0xff]  ;;  %v370_v36 = vld [vmem:[#allocation2 + $0x650] sm:$0xff]  ;;  %v1952_v45 = vpack.c.bf16 %v376_v43, %v373_v42 }
 0x10c   :  { %2085 = vmatprep.subr.bf16.mxu1 %v2084_v56  ;;  %v1920_v47 = vpack.c.bf16 %v328_v39, %v325_v37  ;;  %v407_v56 = vld [vmem:[#allocation2 + $0x778] sm:$0xff]  ;;  %v366_v39 = vld [vmem:[#allocation2 + $0x630] sm:$0xff]  ;;  %v433_v42 = vld [vmem:[#allocation2 + $0x848] sm:$0xff] }
 0x10d   :  { %v436_v43 = vld [vmem:[#allocation2 + $0x860] sm:$0xff] }
 0x10e   :  { %1899 = vmatpush1.bf16.msra.mxu0 %v1898_v49  ;;  %v324_v49 = vld [vmem:[#allocation2 + $0x4e0] sm:$0xff] }
 0x10f   :  { %1901 = vmatprep.subr.bf16.mxu0 %v1900_v50  ;;  %2087 = vmatpush3.bf16.msra.mxu1 %v2086_v2  ;;  %v327_v50 = vld [vmem:[#allocation2 + $0x4f8] sm:$0xff]  ;;  %v1926_v2 = vpack.c.bf16 %v333_v60, %v330_v59  ;;  %v394_v60 = vld [vmem:[#allocation2 + $0x710] sm:$0xff] }
 0x110   :  { %2089 = vmatprep.subr.bf16.mxu1 %v2088_v4  ;;  %v1922_v57 = vpack.c.bf16 %v327_v50, %v324_v49  ;;  %v336_v4 = vld [vmem:[#allocation2 + $0x540] sm:$0xff]  ;;  %v379_v49 = vld [vmem:[#allocation2 + $0x698] sm:$0xff]  ;;  %v382_v50 = vld [vmem:[#allocation2 + $0x6b0] sm:$0xff] }
 0x111   :  { %v1930_v12 = vpack.c.bf16 %v339_v5, %v336_v4  ;;  %v391_v59 = vld [vmem:[#allocation2 + $0x6f8] sm:$0xff]  ;;  %v396_v5 = vld [vmem:[#allocation2 + $0x720] sm:$0xff] }
 0x112   :  { %1903 = vmatpush1.bf16.msra.mxu0 %v1902_v61  ;;  %v337_v61 = vld [vmem:[#allocation2 + $0x548] sm:$0xff] }
 0x113   :  { %1905 = vmatprep.subr.bf16.mxu0 %v1904_v62  ;;  %2091 = vmatpush3.bf16.msra.mxu1 %v2090_v15  ;;  %v2106_v62 = vpack.c.bf16 %v407_v56, %v404_v55  ;;  %v1928_v3 = vpack.c.bf16 %v340_v63, %v337_v61  ;;  %v345_v15 = vld [vmem:[#allocation2 + $0x588] sm:$0xff]  ;;  %v388_v56 = vld [vmem:[#allocation2 + $0x6e0] sm:$0xff]  ;;  %v390_v63 = vld [vmem:[#allocation2 + $0x6f0] sm:$0xff] }
 0x114   :  { %2093 = vmatprep.subr.bf16.mxu1 %v2092_v17  ;;  %v349_v17 = vld [vmem:[#allocation2 + $0x5a8] sm:$0xff]  ;;  %v1934_v20 = vpack.c.bf16 %v345_v15, %v342_v14  ;;  %v402_v14 = vld [vmem:[#allocation2 + $0x750] sm:$0xff] }
 0x115   :  { %v1936_v21 = vpack.c.bf16 %v352_v18, %v349_v17  ;;  %v385_v55 = vld [vmem:[#allocation2 + $0x6c8] sm:$0xff]  ;;  %v412_v18 = vld [vmem:[#allocation2 + $0x7a0] sm:$0xff] }
 0x116   :  { %1907 = vmatpush1.bf16.msra.mxu0 %v1906_v9  ;;  %v346_v9 = vld [vmem:[#allocation2 + $0x590] sm:$0xff]  ;;  %v405_v15 = vld [vmem:[#allocation2 + $0x768] sm:$0xff] }
 0x117   :  { %1909 = vmatprep.subr.bf16.mxu0 %v1908_v10  ;;  %2095 = vmatpush3.bf16.msra.mxu1 %v2094_v26  ;;  %v2496_v10 = vmov 0.0|0.0   ;;  %v1932_v13 = vpack.c.bf16 %v346_v9, %v343_v8  ;;  %v1940_v26 = vpack.c.bf16 %v358_v24, %v355_v11  ;;  %v403_v8 = vld [vmem:[#allocation2 + $0x758] sm:$0xff]  ;;  %v406_v9 = vld [vmem:[#allocation2 + $0x770] sm:$0xff]  ;;  %v409_v17 = vld [vmem:[#allocation2 + $0x788] sm:$0xff] }
 0x118   :  { %2097 = vmatprep.subr.bf16.mxu1 %v2096_v28  ;;  %v357_v28 = vld [vmem:[#allocation2 + $0x5e8] sm:$0xff]  ;;  %v415_v11 = vld [vmem:[#allocation2 + $0x7b8] sm:$0xff]  ;;  %v418_v24 = vld [vmem:[#allocation2 + $0x7d0] sm:$0xff] }
 0x119   :  { %v1942_v31 = vpack.c.bf16 %v357_v28, %v354_v27  ;;  %v414_v27 = vld [vmem:[#allocation2 + $0x7b0] sm:$0xff]  ;;  %v417_v28 = vld [vmem:[#allocation2 + $0x7c8] sm:$0xff] }
 0x11a   :  { %1911 = vmatpush1.bf16.msra.mxu0 %v1910_v22  ;;  %v348_v22 = vld [vmem:[#allocation2 + $0x5a0] sm:$0xff] }
 0x11b   :  { %1913 = vmatprep.subr.bf16.mxu0 %v1912_v23  ;;  %2099 = vmatpush3.bf16.msra.mxu1 %v2098_v38  ;;  %v351_v23 = vld [vmem:[#allocation2 + $0x5b8] sm:$0xff]  ;;  %v1948_v38 = vpack.c.bf16 %v370_v36, %v367_v35  ;;  %v430_v36 = vld [vmem:[#allocation2 + $0x830] sm:$0xff] }
 0x11c   :  { %2101 = vmatprep.subr.bf16.mxu1 %v2100_v41  ;;  %v1938_v25 = vpack.c.bf16 %v351_v23, %v348_v22  ;;  %v369_v41 = vld [vmem:[#allocation2 + $0x648] sm:$0xff]  ;;  %v408_v22 = vld [vmem:[#allocation2 + $0x780] sm:$0xff]  ;;  %v411_v23 = vld [vmem:[#allocation2 + $0x798] sm:$0xff] }
 0x11d   :  { %v1950_v44 = vpack.c.bf16 %v369_v41, %v366_v39  ;;  %v427_v35 = vld [vmem:[#allocation2 + $0x818] sm:$0xff]  ;;  %v426_v39 = vld [vmem:[#allocation2 + $0x810] sm:$0xff]  ;;  %v429_v41 = vld [vmem:[#allocation2 + $0x828] sm:$0xff] }
 0x11e   :  { %1915 = vmatpush1.bf16.msra.mxu0 %v1914_v33  ;;  %v360_v33 = vld [vmem:[#allocation2 + $0x600] sm:$0xff] }
 0x11f   :  { %1917 = vmatprep.subr.bf16.mxu0 %v1916_v34  ;;  %2103 = vmatpush3.bf16.msra.mxu1 %v2102_v52  ;;  %v363_v34 = vld [vmem:[#allocation2 + $0x618] sm:$0xff]  ;;  %v1956_v52 = vpack.c.bf16 %v382_v50, %v379_v49  ;;  %v442_v50 = vld [vmem:[#allocation2 + $0x890] sm:$0xff] }
 0x120   :  { %2105 = vmatprep.subr.bf16.mxu1 %v2104_v54  ;;  %v1946_v37 = vpack.c.bf16 %v363_v34, %v360_v33  ;;  %v381_v54 = vld [vmem:[#allocation2 + $0x6a8] sm:$0xff]  ;;  %v420_v33 = vld [vmem:[#allocation2 + $0x7e0] sm:$0xff]  ;;  %v423_v34 = vld [vmem:[#allocation2 + $0x7f8] sm:$0xff] }
 0x121   :  { %v439_v49 = vld [vmem:[#allocation2 + $0x878] sm:$0xff] }
 0x122   :  { %1919 = vmatpush1.bf16.msra.mxu0 %v1918_v46  ;;  %v372_v46 = vld [vmem:[#allocation2 + $0x660] sm:$0xff] }
 0x123   :  { %1921 = vmatprep.subr.bf16.mxu0 %v1920_v47  ;;  %2107 = vmatpush3.bf16.msra.mxu1 %v2106_v62  ;;  %v375_v47 = vld [vmem:[#allocation2 + $0x678] sm:$0xff]  ;;  %v1964_v62 = vpack.c.bf16 %v394_v60, %v391_v59  ;;  %v454_v60 = vld [vmem:[#allocation2 + $0x8f0] sm:$0xff] }
 0x124   :  { %2108 = vmatprep.subr.bf16.mxu1 %v2496_v10  ;;  %v1954_v51 = vpack.c.bf16 %v375_v47, %v372_v46  ;;  %v432_v46 = vld [vmem:[#allocation2 + $0x840] sm:$0xff]  ;;  %v435_v47 = vld [vmem:[#allocation2 + $0x858] sm:$0xff] }
 0x125   :  { %v451_v59 = vld [vmem:[#allocation2 + $0x8d8] sm:$0xff] }
 0x126   :  { %1923 = vmatpush1.bf16.msra.mxu0 %v1922_v57  ;;  %972 = vmatmul.mubr.f32.vlgmr.msra.gmra.mrb[4].mxu1 %v2715_v6  ;;  %v1960_v57 = vpack.c.bf16 %v388_v56, %v385_v55  ;;  %v445_v55 = vld [vmem:[#allocation2 + $0x8a8] sm:$0xff]  ;;  %v448_v56 = vld [vmem:[#allocation2 + $0x8c0] sm:$0xff] }
 0x127   :  { %1925 = vmatprep.subr.bf16.mxu0 %v1924_v58  ;;  %2110 = vmatpush3.bf16.msra.mxu1 %v2109_v7  ;;  %v384_v58 = vld [vmem:[#allocation2 + $0x6c0] sm:$0xff]  ;;  %v399_v7 = vld [vmem:[#allocation2 + $0x738] sm:$0xff] }
 0x128   :  { %1743 = vmatprep.mubr.msk.f32.mxu1 %vm2497_vm1, %v2498_v19 }
 0x12a   :  { %1927 = vmatpush1.bf16.msra.mxu0 %v1926_v2  ;;  %1744 = vmatmul.mubr.msk.f32.vlgmr.msra.gmra.mrb[6].mxu1 %vm479_vm0, %v2722_v16  ;;  %v400_v2 = vld [vmem:[#allocation2 + $0x740] sm:$0xff] }
 0x12b   :  { %1929 = vmatprep.subr.bf16.mxu0 %v1928_v3  ;;  %v1966_v3 = vpack.c.bf16 %v393_v0, %v390_v63  ;;  %v1968_v4 = vpack.c.bf16 %v400_v2, %v397_v1  ;;  %v450_v63 = vld [vmem:[#allocation2 + $0x8d0] sm:$0xff]  ;;  %v453_v0 = vld [vmem:[#allocation2 + $0x8e8] sm:$0xff]  ;;  %v460_v2 = vld [vmem:[#allocation2 + $0x920] sm:$0xff] }
 0x12c   :  { %v457_v1 = vld [vmem:[#allocation2 + $0x908] sm:$0xff] }
 0x12e   :  { %1931 = vmatpush1.bf16.msra.mxu0 %v1930_v12  ;;  %v1970_v12 = vpack.c.bf16 %v399_v7, %v396_v5  ;;  %v456_v5 = vld [vmem:[#allocation2 + $0x900] sm:$0xff]  ;;  %v459_v7 = vld [vmem:[#allocation2 + $0x918] sm:$0xff] }
 0x12f   :  { %1933 = vmatprep.subr.bf16.mxu0 %v1932_v13  ;;  %v1972_v13 = vpack.c.bf16 %v406_v9, %v403_v8  ;;  %v2010_v8 = vpack.c.bf16 %v459_v7, %v456_v5  ;;  %v1221_v5 = vld [vmem:[#allocation10 + $0x60] sm:$0xff]  ;;  %v1222_v7 = vld [vmem:[#allocation10 + $0x68] sm:$0xff] }
 0x132   :  { %1935 = vmatpush1.bf16.msra.mxu0 %v1934_v20  ;;  %v1974_v20 = vpack.c.bf16 %v405_v15, %v402_v14  ;;  %v464_v14 = vlaneseq }
 0x133   :  { %1937 = vmatprep.subr.bf16.mxu0 %v1936_v21  ;;  %v1976_v21 = vpack.c.bf16 %v412_v18, %v409_v17  ;;  %v2739_v18 = vld [vmem:[#allocation5] sm:$0x7] }
 0x134   :  { %v2734_v15 = vshrl.u32 %v464_v14, 7  ;;  %v1223_v14 = vld [vmem:[#allocation10 + $0x70] sm:$0xff] }
 0x136   :  { %1939 = vmatpush1.bf16.msra.mxu0 %v1938_v25  ;;  %v1978_v25 = vpack.c.bf16 %v411_v23, %v408_v22  ;;  %v2737_v17 = vsub.s32 2, %v2734_v15 }
 0x137   :  { %1941 = vmatprep.subr.bf16.mxu0 %v1940_v26  ;;  %v1980_v26 = vpack.c.bf16 %v418_v24, %v415_v11  ;;  %v1226_v24 = vld [vmem:[#allocation10 + $0x88] sm:$0xff] }
 0x13a   :  { %1943 = vmatpush1.bf16.msra.mxu0 %v1942_v31  ;;  %v1982_v31 = vpack.c.bf16 %v417_v28, %v414_v27  ;;  %v1210_v27 = vld [vmem:[#allocation10 + $0x8] sm:$0xff]  ;;  %v1227_v28 = vld [vmem:[#allocation10 + $0x90] sm:$0xff] }
 0x13b   :  { %1945 = vmatprep.subr.bf16.mxu0 %v1944_v32  ;;  %v1984_v32 = vpack.c.bf16 %v424_v30, %v421_v29  ;;  %v1228_v29 = vld [vmem:[#allocation10 + $0x98] sm:$0xff] }
 0x13d   :  { %619 = vmatmul.mubr.f32.vlgmr.msra.gmra.mrb[0].mxu0 %v2703_v40  ;;  %v1958_v40 = vpack.c.bf16 %v381_v54, %v378_v53  ;;  %v438_v53 = vld [vmem:[#allocation2 + $0x870] sm:$0xff]  ;;  %v441_v54 = vld [vmem:[#allocation2 + $0x888] sm:$0xff] }
 0x13e   :  { %1947 = vmatpush1.bf16.msra.mxu0 %v1946_v37  ;;  %689 = vmatprep.mubr.f32.mxu0 %v2708_v48  ;;  %v387_v48 = vld [vmem:[#allocation2 + $0x6d8] sm:$0xff]  ;;  %v1986_v37 = vpack.c.bf16 %v423_v34, %v420_v33 }
 0x13f   :  { %1949 = vmatprep.subr.bf16.mxu0 %v1948_v38  ;;  %v1962_v61 = vpack.c.bf16 %v387_v48, %v384_v58  ;;  %v1988_v38 = vpack.c.bf16 %v430_v36, %v427_v35  ;;  %v444_v58 = vld [vmem:[#allocation2 + $0x8a0] sm:$0xff]  ;;  %v447_v48 = vld [vmem:[#allocation2 + $0x8b8] sm:$0xff] }
 0x140   :  { %v1212_v33 = vld [vmem:[#allocation10 + $0x18] sm:$0xff]  ;;  %v1229_v34 = vld [vmem:[#allocation10 + $0xa0] sm:$0xff]  ;;  %v1230_v35 = vld [vmem:[#allocation10 + $0xa8] sm:$0xff] }
 0x142   :  { %1951 = vmatpush1.bf16.msra.mxu0 %v1950_v44  ;;  %v1990_v44 = vpack.c.bf16 %v429_v41, %v426_v39  ;;  %v1214_v39 = vld [vmem:[#allocation10 + $0x28] sm:$0xff]  ;;  %v1231_v41 = vld [vmem:[#allocation10 + $0xb0] sm:$0xff] }
 0x143   :  { %1953 = vmatprep.subr.bf16.mxu0 %v1952_v45  ;;  %v1992_v45 = vpack.c.bf16 %v436_v43, %v433_v42  ;;  %v1232_v42 = vld [vmem:[#allocation10 + $0xb8] sm:$0xff] }
 0x146   :  { %1955 = vmatpush1.bf16.msra.mxu0 %v1954_v51  ;;  %v1994_v51 = vpack.c.bf16 %v435_v47, %v432_v46  ;;  %v1216_v46 = vld [vmem:[#allocation10 + $0x38] sm:$0xff]  ;;  %v1233_v47 = vld [vmem:[#allocation10 + $0xc0] sm:$0xff] }
 0x147   :  { %1957 = vmatprep.subr.bf16.mxu0 %v1956_v52  ;;  %v1996_v52 = vpack.c.bf16 %v442_v50, %v439_v49  ;;  %v1234_v49 = vld [vmem:[#allocation10 + $0xc8] sm:$0xff] }
 0x14a   :  { %1959 = vmatpush1.bf16.msra.mxu0 %v1958_v40  ;;  %v1998_v40 = vpack.c.bf16 %v441_v54, %v438_v53  ;;  %v2127_v53 = vpack.c.bf16 %v1234_v49, %v1233_v47  ;;  %v1217_v54 = vld [vmem:[#allocation10 + $0x40] sm:$0xff] }
 0x14b   :  { %1961 = vmatprep.subr.bf16.mxu0 %v1960_v57  ;;  %v2000_v57 = vpack.c.bf16 %v448_v56, %v445_v55  ;;  %v1218_v55 = vld [vmem:[#allocation10 + $0x48] sm:$0xff] }
 0x14e   :  { %1963 = vmatpush1.bf16.msra.mxu0 %v1962_v61  ;;  %v2002_v61 = vpack.c.bf16 %v447_v48, %v444_v58 }
 0x14f   :  { %1965 = vmatprep.subr.bf16.mxu0 %v1964_v62  ;;  %v2004_v62 = vpack.c.bf16 %v454_v60, %v451_v59  ;;  %v2129_v59 = vpack.c.bf16 %v1218_v55, %v1217_v54 }
 0x152   :  { %1967 = vmatpush1.bf16.msra.mxu0 %v1966_v3  ;;  %v2006_v3 = vpack.c.bf16 %v453_v0, %v450_v63  ;;  %v1220_v63 = vld [vmem:[#allocation10 + $0x58] sm:$0xff] }
 0x153   :  { %1969 = vmatprep.subr.bf16.mxu0 %v1968_v4  ;;  %v2008_v4 = vpack.c.bf16 %v460_v2, %v457_v1  ;;  %v1237_v1 = vld [vmem:[#allocation10 + $0xe0] sm:$0xff]  ;;  %v1238_v2 = vld [vmem:[#allocation10 + $0xe8] sm:$0xff] }
 0x156   :  { %1971 = vmatpush1.bf16.msra.mxu0 %v1970_v12 }
 0x157   :  { %1973 = vmatprep.subr.bf16.mxu0 %v1972_v13 }
 0x15a   :  { %1975 = vmatpush1.bf16.msra.mxu0 %v1974_v20 }
 0x15b   :  { %1977 = vmatprep.subr.bf16.mxu0 %v1976_v21 }
 0x15e   :  { %1979 = vmatpush1.bf16.msra.mxu0 %v1978_v25  ;;  %v1209_v25 = vld [vmem:[#allocation10] sm:$0xff] }
 0x15f   :  { %1981 = vmatprep.subr.bf16.mxu0 %v1980_v26  ;;  %v2113_v30 = vpack.c.bf16 %v1210_v27, %v1209_v25  ;;  %v2751_v27 = vsub.s32 0, %v2734_v15 }
 0x162   :  { %1983 = vmatpush1.bf16.msra.mxu0 %v1982_v31  ;;  %v2115_v31 = vpack.c.bf16 %v1228_v29, %v1227_v28  ;;  %v2754_v28 = vsub.s32 1, %v2734_v15 }
 0x163   :  { %1985 = vmatprep.subr.bf16.mxu0 %v1984_v32  ;;  %v1211_v32 = vld [vmem:[#allocation10 + $0x10] sm:$0xff] }
 0x164   :  { %v2117_v36 = vpack.c.bf16 %v1212_v33, %v1211_v32  ;;  %v471_v32 = vrot.slane %v2739_v18, %v2754_v28 }
 0x166   :  { %1987 = vmatpush1.bf16.msra.mxu0 %v1986_v37  ;;  %v2119_v37 = vpack.c.bf16 %v1230_v35, %v1229_v34 }
 0x167   :  { %1989 = vmatprep.subr.bf16.mxu0 %v1988_v38  ;;  %v1213_v38 = vld [vmem:[#allocation10 + $0x20] sm:$0xff] }
 0x168   :  { %v2121_v43 = vpack.c.bf16 %v1214_v39, %v1213_v38 }
 0x16a   :  { %1991 = vmatpush1.bf16.msra.mxu0 %v1990_v44  ;;  %v2123_v44 = vpack.c.bf16 %v1232_v42, %v1231_v41 }
 0x16b   :  { %1993 = vmatprep.subr.bf16.mxu0 %v1992_v45  ;;  %v1215_v45 = vld [vmem:[#allocation10 + $0x30] sm:$0xff] }
 0x16e   :  { %1995 = vmatpush1.bf16.msra.mxu0 %v1994_v51  ;;  %v2125_v51 = vpack.c.bf16 %v1216_v46, %v1215_v45 }
 0x16f   :  { %1997 = vmatprep.subr.bf16.mxu0 %v1996_v52 }
 0x172   :  { %1999 = vmatpush1.bf16.msra.mxu0 %v1998_v40  ;;  %v1235_v40 = vld [vmem:[#allocation10 + $0xd0] sm:$0xff] }
 0x173   :  { %2001 = vmatprep.subr.bf16.mxu0 %v2000_v57  ;;  %v1236_v57 = vld [vmem:[#allocation10 + $0xd8] sm:$0xff] }
 0x176   :  { %2003 = vmatpush1.bf16.msra.mxu0 %v2002_v61  ;;  %v2131_v61 = vpack.c.bf16 %v1236_v57, %v1235_v40 }
 0x177   :  { %2005 = vmatprep.subr.bf16.mxu0 %v2004_v62  ;;  %v1219_v62 = vld [vmem:[#allocation10 + $0x50] sm:$0xff] }
 0x17a   :  { %2007 = vmatpush1.bf16.msra.mxu0 %v2006_v3  ;;  %v2133_v3 = vpack.c.bf16 %v1220_v63, %v1219_v62 }
 0x17b   :  { %2009 = vmatprep.subr.bf16.mxu0 %v2008_v4  ;;  %v2135_v4 = vpack.c.bf16 %v1238_v2, %v1237_v1 }
 0x17d   :  { %690 = vmatmul.mubr.f32.vlgmr.msra.gmra.mrb[0].mxu0 %v2715_v6  ;;  %v475_v6 = vrot.slane %v2739_v18, %v2737_v17 }
 0x17e   :  { %2011 = vmatpush1.bf16.msra.mxu0 %v2010_v8  ;;  %760 = vmatprep.mubr.f32.mxu0 %v2498_v19  ;;  %v1239_v8 = vld [vmem:[#allocation10 + $0xf0] sm:$0xff] }
 0x185   :  { %1558 = vmatmul.mubr.msk.f32.vlgmr.msra.gmra.mrb[0].mxu0 %vm479_vm0, %v2722_v16  ;;  %v1225_v16 = vld [vmem:[#allocation10 + $0x80] sm:$0xff] }
 0x186   :  { %v2111_v26 = vpack.c.bf16 %v1226_v24, %v1225_v16 }
 0x188   :  { %2112 = vmatprep.subr.bf16.mxu1 %v2111_v26 }
 0x189   :  { %2114 = vmatpush3.bf16.msra.mxu1 %v2113_v30 }
 0x18a   :  { %2116 = vmatprep.subr.bf16.mxu1 %v2115_v31  ;;  %v467_v31 = vrot.slane %v2739_v18, %v2751_v27 }
 0x18d   :  { %2118 = vmatpush3.bf16.msra.mxu1 %v2117_v36 }
 0x18e   :  { %2120 = vmatprep.subr.bf16.mxu1 %v2119_v37 }
 0x191   :  { %2122 = vmatpush3.bf16.msra.mxu1 %v2121_v43 }
 0x192   :  { %2124 = vmatprep.subr.bf16.mxu1 %v2123_v44 }
 0x195   :  { %2126 = vmatpush3.bf16.msra.mxu1 %v2125_v51 }
 0x196   :  { %2128 = vmatprep.subr.bf16.mxu1 %v2127_v53 }
 0x199   :  { %2130 = vmatpush3.bf16.msra.mxu1 %v2129_v59 }
 0x19a   :  { %2132 = vmatprep.subr.bf16.mxu1 %v2131_v61 }
 0x19d   :  { %2134 = vmatpush3.bf16.msra.mxu1 %v2133_v3 }
 0x19e   :  { %2136 = vmatprep.subr.bf16.mxu1 %v2135_v4 }
 0x1b8   :  { %v1594_v9 = vpop.f32.mrb[0].mxu1 }
 0x1b9   :  { %v1595_v12 = vpop.f32.mrb[1].mxu1 }
 0x1ba   :  { %v1596_v13 = vadd.f32 %v1595_v12, %v1594_v9  ;;  %v1240_v9 = vld [vmem:[#allocation10 + $0xf8] sm:$0xff]  ;;  %v2137_v12 = vpack.c.bf16 %v1222_v7, %v1221_v5 }
 0x1bc   :  { %v834_v20 = vadd.f32 %v1596_v13, %v475_v6  ;;  %v2139_v13 = vpack.c.bf16 %v1240_v9, %v1239_v8  ;;  %v1224_v6 = vld [vmem:[#allocation10 + $0x78] sm:$0xff]  ;;  %2138 = vmatpush3.bf16.msra.mxu1 %v2137_v12 }
 0x1be   :  { %2140 = vmatprep.subr.bf16.mxu1 %v2139_v13 }
 0x1d9   :  { %v1629_v21 = vpop.f32.mrb[2].mxu1 }
 0x1da   :  { %v1630_v22 = vpop.f32.mrb[3].mxu1 }
 0x1db   :  { %v1631_v23 = vadd.f32 %v1630_v22, %v1629_v21 }
 0x1dd   :  { %v904_v11 = vadd.f32 %v1631_v23, %v834_v20  ;;  %v2141_v20 = vpack.c.bf16 %v1224_v6, %v1223_v14 }
 0x1df   :  { %2142 = vmatpush3.bf16.msra.mxu1 %v2141_v20 }
 0x1e0   :  { %2143 = vmatprep.subr.bf16.mxu1 %v2496_v10 }
 0x1f9   :  { %v1664_v50 = vpop.f32.mrb[4].mxu1 }
 0x1fa   :  { %v1665_v52 = vpop.f32.mrb[5].mxu1 }
 0x1fb   :  { %v1666_v56 = vadd.f32 %v1665_v52, %v1664_v50 }
 0x1fd   :  { %v974_v58 = vadd.f32 %v1666_v56, %v904_v11  ;;  %v1043_v48 = vpop.f32.mrb[6].mxu1 }
 0x1fe   :  { %v1745_v60 = vpop.f32.mrb[7].mxu1 }
 0x1ff   :  { %v2743_v0 = vadd.f32 %v1043_v48, %v974_v58 }
 0x201   :  { %v1059_v21 = vrot.slane %v2743_v0, 4  ;;  %v1070_v22 = vmul.f32 %v2743_v0, %v2743_v0 }
 0x203   :  { %v1060_v23 = vadd.f32 %v1059_v21, %v2743_v0  ;;  %v1083_v11 = vrot.slane %v1070_v22, 4 }
 0x205   :  { %v1061_v16 = vrot.slane %v1060_v23, 2  ;;  %v1084_v24 = vadd.f32 %v1083_v11, %v1070_v22 }
 0x207   :  { %v1062_v25 = vadd.f32 %v1061_v16, %v1060_v23  ;;  %v1085_v26 = vrot.slane %v1084_v24, 2 }
 0x209   :  { %v1063_v29 = vrot.slane %v1062_v25, 1  ;;  %v1086_v30 = vadd.f32 %v1085_v26, %v1084_v24 }
 0x20b   :  { %v1064_v33 = vadd.f32 %v1063_v29, %v1062_v25  ;;  %v1087_v34 = vrot.slane %v1086_v30, 1  ;;  %v2499_v25 = vmov 1966171168  }
 0x20c   :  { %v1113_v26 = vunpack.c.l.s4 %v2499_v25 }
 0x20d   :  { %v2767_v42 = vmul.f32 0.125, %v1064_v33  ;;  %v1088_v43 = vadd.f32 %v1087_v34, %v1086_v30 }
 0x20e   :  { %v1114_v29 = vunpack.c.0.s8 %v1113_v26 }
 0x20f   :  { %v1091_v52 = vmul.f32 0.125, %v1088_v43  ;;  %v1094_v53 = vmul.f32 %v2767_v42, %v2767_v42 }
 0x211   :  { %v1097_v60 = vsub.f32 %v1091_v52, %v1094_v53 }
 0x213   :  { %v1100_v7 = vmax.f32 %v1097_v60, 0.0 }
 0x215   :  { %v1104_v21 = vadd.f32 1e-05, %v1100_v7  ;;  %v1247_v7 = vld [vmem:[#allocation10 + $0x130] sm:$0xff] }
 0x217   :  { %2218 = vrsqrt.f32 %v1104_v21 }
 0x221   :  { %v2219_v30 = vpop.eup %2218 }
 0x258   :  { %v762_v35 = vpop.f32.mrb[0].mxu0 }
 0x259   :  { %v2760_v36 = vadd.f32 %v762_v35, %v467_v31  ;;  %v764_v37 = vpop.f32.mrb[1].mxu0 }
 0x25a   :  { %v2762_v38 = vadd.f32 %v764_v37, %v471_v32  ;;  %v1117_v32 = vsub.s32 %v1114_v29, %v2734_v15  ;;  %v1444_v29 = vld [vmem:[#allocation16] sm:$0xff] }
 0x25b   :  { %v1047_v39 = vrot.slane %v2760_v36, 4  ;;  %v1068_v41 = vmul.f32 %v2760_v36, %v2760_v36 }
 0x25c   :  { %v1053_v44 = vrot.slane %v2762_v38, 4  ;;  %v1069_v18 = vmul.f32 %v2762_v38, %v2762_v38  ;;  %v1125_v37 = vrot.slane %v2219_v30, %v1117_v32  ;;  %v1445_v30 = vld [vmem:[#allocation16 + $0x8] sm:$0xff] }
 0x25d   :  { %v1048_v45 = vadd.f32 %v2760_v36, %v1047_v39  ;;  %v1071_v46 = vrot.slane %v1068_v41, 4 }
 0x25e   :  { %v1054_v47 = vadd.f32 %v2762_v38, %v1053_v44  ;;  %v1077_v49 = vrot.slane %v1069_v18, 4 }
 0x25f   :  { %v1049_v50 = vrot.slane %v1048_v45, 2  ;;  %v1072_v51 = vadd.f32 %v1071_v46, %v1068_v41  ;;  %v1101_v41 = vld [vmem:[#allocation7] sm:$0x7] }
 0x260   :  { %v1055_v54 = vrot.slane %v1054_v47, 2  ;;  %v1078_v55 = vadd.f32 %v1077_v49, %v1069_v18 }
 0x261   :  { %v1050_v56 = vadd.f32 %v1049_v50, %v1048_v45  ;;  %v1073_v40 = vrot.slane %v1072_v51, 2 }
 0x262   :  { %v1056_v57 = vadd.f32 %v1055_v54, %v1054_v47  ;;  %v1079_v58 = vrot.slane %v1078_v55, 2 }
 0x263   :  { %v1051_v48 = vrot.slane %v1050_v56, 1  ;;  %v1074_v59 = vadd.f32 %v1073_v40, %v1072_v51 }
 0x264   :  { %v1057_v61 = vrot.slane %v1056_v57, 1  ;;  %v1080_v62 = vadd.f32 %v1079_v58, %v1078_v55 }
 0x265   :  { %v1052_v63 = vadd.f32 %v1051_v48, %v1050_v56  ;;  %v1075_v1 = vrot.slane %v1074_v59, 1  ;;  %v1136_v56 = vld [vmem:[#allocation8] sm:$0x7] }
 0x266   :  { %v1058_v2 = vadd.f32 %v1057_v61, %v1056_v57  ;;  %v1081_v3 = vrot.slane %v1080_v62, 1  ;;  %v1242_v61 = vld [vmem:[#allocation10 + $0x108] sm:$0xff] }
 0x267   :  { %v1065_v4 = vmul.f32 0.125, %v1052_v63  ;;  %v1076_v5 = vadd.f32 %v1075_v1, %v1074_v59 }
 0x268   :  { %v1082_v8 = vadd.f32 %v1081_v3, %v1080_v62  ;;  %v1066_v9 = vmul.f32 0.125, %v1058_v2  ;;  %v1243_v3 = vld [vmem:[#allocation10 + $0x110] sm:$0xff] }
 0x269   :  { %v1089_v12 = vmul.f32 0.125, %v1076_v5  ;;  %v1092_v13 = vmul.f32 %v1065_v4, %v1065_v4 }
 0x26a   :  { %v1090_v14 = vmul.f32 0.125, %v1082_v8  ;;  %v1093_v6 = vmul.f32 %v1066_v9, %v1066_v9  ;;  %v1248_v8 = vld [vmem:[#allocation10 + $0x138] sm:$0xff] }
 0x26b   :  { %v1095_v20 = vsub.f32 %v1089_v12, %v1092_v13  ;;  %v1249_v12 = vld [vmem:[#allocation10 + $0x140] sm:$0xff]  ;;  %v1250_v13 = vld [vmem:[#allocation10 + $0x148] sm:$0xff] }
 0x26c   :  { %v1096_v22 = vsub.f32 %v1090_v14, %v1093_v6  ;;  %v2156_v14 = vpack.c.bf16 %v1250_v13, %v1249_v12  ;;  %v1251_v6 = vld [vmem:[#allocation10 + $0x150] sm:$0xff]  ;;  %v1422_v13 = vld [vmem:[#allocation13] sm:$0x1] }
 0x26d   :  { %v1098_v23 = vmax.f32 %v1095_v20, 0.0  ;;  %v1252_v20 = vld [vmem:[#allocation10 + $0x158] sm:$0xff] }
 0x26e   :  { %v1099_v11 = vmax.f32 %v1096_v22, 0.0  ;;  %v2159_v21 = vpack.c.bf16 %v1252_v20, %v1251_v6  ;;  %v1253_v22 = vld [vmem:[#allocation10 + $0x160] sm:$0xff] }
 0x26f   :  { %v1102_v16 = vadd.f32 1e-05, %v1098_v23  ;;  %v1254_v23 = vld [vmem:[#allocation10 + $0x168] sm:$0xff]  ;;  %v1426_v20 = vld [vmem:[#allocation14] sm:$0x1] }
 0x270   :  { %v1103_v24 = vadd.f32 1e-05, %v1099_v11  ;;  %v2162_v11 = vpack.c.bf16 %v1254_v23, %v1253_v22 }
 0x271   :  { %2220 = vrsqrt.f32 %v1102_v16  ;;  %v1255_v16 = vld [vmem:[#allocation10 + $0x170] sm:$0xff] }
 0x272   :  { %2222 = vrsqrt.f32 %v1103_v24  ;;  %v1256_v24 = vld [vmem:[#allocation10 + $0x178] sm:$0xff] }
 0x273   :  { %v2165_v25 = vpack.c.bf16 %v1256_v24, %v1255_v16 }
 0x27b   :  { %v2221_v31 = vpop.eup %2220 }
 0x27c   :  { %v2223_v33 = vpop.eup %2222 }
 0x27d   :  { %v1111_v34 = vcombine.low %v2221_v31, %v2223_v33  ;;  %v2168_v31 = vpack.c.bf16 %v1445_v30, %v1444_v29  ;;  %v1447_v33 = vld [vmem:[#allocation16 + $0x18] sm:$0xff] }
 0x27f   :  { %v1118_v35 = vrot.slane %v1111_v34, %v1117_v32 }
 0x281   :  { %v1126_v39 = vcombine.low %v1118_v35, %v1125_v37  ;;  %v1448_v35 = vld [vmem:[#allocation16 + $0x20] sm:$0xff]  ;;  %v1449_v37 = vld [vmem:[#allocation16 + $0x28] sm:$0xff] }
 0x283   :  { %v1133_v43 = vrot.slane %v1126_v39, %v1117_v32  ;;  %v2174_v39 = vpack.c.bf16 %v1449_v37, %v1448_v35 }
 0x285   :  { %v1135_v44 = vmul.f32 %v1133_v43, %v1101_v41  ;;  %v1450_v41 = vld [vmem:[#allocation16 + $0x30] sm:$0xff] }
 0x287   :  { %v1141_v18 = vrot.slane %v1135_v44, %v2751_v27  ;;  %v1145_v45 = vrot.slane %v1135_v44, %v2754_v28  ;;  %v1149_v46 = vrot.slane %v1135_v44, %v2737_v17  ;;  %v1452_v44 = vld [vmem:[#allocation16 + $0x40] sm:$0xff] }
 0x289   :  { %v1153_v47 = vmul.f32 %v1141_v18, %v1065_v4  ;;  %v1154_v49 = vmul.f32 %v1145_v45, %v1066_v9  ;;  %v1155_v50 = vmul.f32 %v1149_v46, %v2767_v42  ;;  %v1185_v15 = vmul.f32 %v2762_v38, %v1145_v45  ;;  %v1241_v42 = vld [vmem:[#allocation10 + $0x100] sm:$0xff]  ;;  %v1244_v4 = vld [vmem:[#allocation10 + $0x118] sm:$0xff] }
 0x28a   :  { %v1184_v51 = vmul.f32 %v2760_v36, %v1141_v18  ;;  %v1186_v59 = vmul.f32 %v1149_v46, %v2743_v0  ;;  %v2144_v2 = vpack.c.bf16 %v1242_v61, %v1241_v42  ;;  %v1246_v0 = vld [vmem:[#allocation10 + $0x128] sm:$0xff]  ;;  %v2153_v9 = vpack.c.bf16 %v1248_v8, %v1247_v7  ;;  %v1454_v46 = vld [vmem:[#allocation16 + $0x50] sm:$0xff] }
 0x28b   :  { %v1159_v52 = vcombine.low %v1153_v47, %v1154_v49  ;;  %v1173_v54 = vrot.slane %v1155_v50, %v1117_v32  ;;  %v1453_v18 = vld [vmem:[#allocation16 + $0x48] sm:$0xff]  ;;  %v1455_v47 = vld [vmem:[#allocation16 + $0x58] sm:$0xff]  ;;  %v1456_v50 = vld [vmem:[#allocation16 + $0x60] sm:$0xff] }
 0x28c   :  { %v2180_v45 = vpack.c.bf16 %v1453_v18, %v1452_v44  ;;  %v2183_v49 = vpack.c.bf16 %v1455_v47, %v1454_v46 }
 0x28d   :  { %v1166_v53 = vrot.slane %v1159_v52, %v1117_v32  ;;  %v1458_v52 = vld [vmem:[#allocation16 + $0x70] sm:$0xff] }
 0x28f   :  { %v1174_v55 = vcombine.low %v1166_v53, %v1173_v54  ;;  %v1459_v53 = vld [vmem:[#allocation16 + $0x78] sm:$0xff] }
 0x290   :  { %v2189_v54 = vpack.c.bf16 %v1459_v53, %v1458_v52 }
 0x291   :  { %v1181_v40 = vrot.slane %v1174_v55, %v1117_v32  ;;  %v1446_v32 = vld [vmem:[#allocation16 + $0x10] sm:$0xff] }
 0x292   :  { %v2171_v34 = vpack.c.bf16 %v1447_v33, %v1446_v32 }
 0x293   :  { %v1183_v57 = vsub.f32 %v1136_v56, %v1181_v40 }
 0x295   :  { %v1195_v58 = vrot.slane %v1183_v57, %v2754_v28  ;;  %v1191_v48 = vrot.slane %v1183_v57, %v2751_v27  ;;  %v1199_v60 = vrot.slane %v1183_v57, %v2737_v17  ;;  %v2147_v28 = vpack.c.bf16 %v1244_v4, %v1243_v3  ;;  %v1245_v17 = vld [vmem:[#allocation10 + $0x120] sm:$0xff] }
 0x296   :  { %v2150_v5 = vpack.c.bf16 %v1246_v0, %v1245_v17  ;;  %v1560_v57 = vld [vmem:[#allocation11] ss:$0 sm:$0xff] }
 0x297   :  { %v1204_v38 = vadd.f32 %v1195_v58, %v1185_v15  ;;  %v1203_v62 = vadd.f32 %v1191_v48, %v1184_v51  ;;  %v1205_v36 = vadd.f32 %v1199_v60, %v1186_v59  ;;  %v1457_v15 = vld [vmem:[#allocation16 + $0x68] sm:$0xff] }
 0x298   :  { %v2186_v51 = vpack.c.bf16 %v1457_v15, %v1456_v50 }
 0x299   :  { %v1207_v63 = vmax.f32 %v1204_v38, 0.0  ;;  %v1206_v1 = vmax.f32 %v1203_v62, 0.0  ;;  %v1208_v26 = vmax.f32 %v1205_v36, 0.0 }
 0x29b   :  { %1328 = vmatprep.mubr.f32.mxu1 %v1207_v63 }
 0x29c   :  { %1329 = vmatmul.mubr.f32.vlgmr.msra.gmra.mrb[8].mxu1 %v1206_v1 }
 0x29d   :  { %2145 = vmatpush3.bf16.msra.mxu1 %v2144_v2  ;;  %1778 = vmatprep.mubr.msk.f32.mxu1 %vm2497_vm1, %v2498_v19 }
 0x29e   :  { %2146 = vmatprep.subr.bf16.mxu1 %v2496_v10 }
 0x2a1   :  { %2148 = vmatpush3.bf16.msra.mxu1 %v2147_v28 }
 0x2a2   :  { %2149 = vmatprep.subr.bf16.mxu1 %v2496_v10 }
 0x2a5   :  { %2151 = vmatpush3.bf16.msra.mxu1 %v2150_v5 }
 0x2a6   :  { %2152 = vmatprep.subr.bf16.mxu1 %v2496_v10 }
 0x2a9   :  { %2154 = vmatpush3.bf16.msra.mxu1 %v2153_v9 }
 0x2aa   :  { %2155 = vmatprep.subr.bf16.mxu1 %v2496_v10 }
 0x2ad   :  { %2157 = vmatpush3.bf16.msra.mxu1 %v2156_v14 }
 0x2ae   :  { %2158 = vmatprep.subr.bf16.mxu1 %v2496_v10 }
 0x2b1   :  { %2160 = vmatpush3.bf16.msra.mxu1 %v2159_v21 }
 0x2b2   :  { %2161 = vmatprep.subr.bf16.mxu1 %v2496_v10 }
 0x2b5   :  { %2163 = vmatpush3.bf16.msra.mxu1 %v2162_v11 }
 0x2b6   :  { %2164 = vmatprep.subr.bf16.mxu1 %v2496_v10 }
 0x2b9   :  { %2166 = vmatpush3.bf16.msra.mxu1 %v2165_v25 }
 0x2ba   :  { %2167 = vmatprep.subr.bf16.mxu1 %v2496_v10 }
 0x2bc   :  { %1779 = vmatmul.mubr.f32.vlgmr.msra.gmra.mrb[10].mxu1 %v1208_v26  ;;  %v1561_v26 = vld [vmem:[#allocation17] ss:$0 sm:$0xff] }
 0x2bd   :  { %1813 = vmatprep.mubr.msk.f32.mxu1 %vm2497_vm1, %v2498_v19  ;;  %2169 = vmatpush3.bf16.msra.mxu1 %v2168_v31  ;;  %v1451_v19 = vld [vmem:[#allocation16 + $0x38] sm:$0xff] }
 0x2be   :  { %2170 = vmatprep.subr.bf16.mxu1 %v2496_v10  ;;  %v2177_v43 = vpack.c.bf16 %v1451_v19, %v1450_v41 }
 0x2c1   :  { %2172 = vmatpush3.bf16.msra.mxu1 %v2171_v34 }
 0x2c2   :  { %2173 = vmatprep.subr.bf16.mxu1 %v2496_v10 }
 0x2c5   :  { %2175 = vmatpush3.bf16.msra.mxu1 %v2174_v39 }
 0x2c6   :  { %2176 = vmatprep.subr.bf16.mxu1 %v2496_v10 }
 0x2c9   :  { %2178 = vmatpush3.bf16.msra.mxu1 %v2177_v43 }
 0x2ca   :  { %2179 = vmatprep.subr.bf16.mxu1 %v2496_v10 }
 0x2cd   :  { %2181 = vmatpush3.bf16.msra.mxu1 %v2180_v45 }
 0x2ce   :  { %2182 = vmatprep.subr.bf16.mxu1 %v2496_v10 }
 0x2d1   :  { %2184 = vmatpush3.bf16.msra.mxu1 %v2183_v49 }
 0x2d2   :  { %2185 = vmatprep.subr.bf16.mxu1 %v2496_v10 }
 0x2d5   :  { %2187 = vmatpush3.bf16.msra.mxu1 %v2186_v51 }
 0x2d6   :  { %2188 = vmatprep.subr.bf16.mxu1 %v2496_v10 }
 0x2d9   :  { %2190 = vmatpush3.bf16.msra.mxu1 %v2189_v54 }
 0x36f   :  { %v1702_v55 = vpop.f32.mrb[8].mxu1 }
 0x370   :  { %v1703_v56 = vpop.f32.mrb[9].mxu1 }
 0x371   :  { %v1704_v40 = vadd.f32 %v1703_v56, %v1702_v55 }
 0x373   :  { %v1331_v58 = vadd.f32 %v1704_v40, %v1560_v57 }
 0x38f   :  { %v1400_v48 = vpop.f32.mrb[10].mxu1 }
 0x390   :  { %v1401_v59 = vadd.f32 %v1400_v48, %v1331_v58  ;;  %v1780_v60 = vpop.f32.mrb[11].mxu1 }
 0x392   :  { %v1404_v42 = vrot.slane %v1401_v59, 4  ;;  %v1411_v61 = vmul.f32 %v1401_v59, %v1401_v59 }
 0x394   :  { %v1405_v38 = vadd.f32 %v1404_v42, %v1401_v59  ;;  %v1412_v62 = vrot.slane %v1411_v61, 4 }
 0x396   :  { %v1406_v36 = vrot.slane %v1405_v38, 2  ;;  %v1413_v63 = vadd.f32 %v1412_v62, %v1411_v61 }
 0x398   :  { %v1407_v1 = vadd.f32 %v1406_v36, %v1405_v38  ;;  %v1414_v2 = vrot.slane %v1413_v63, 2 }
 0x39a   :  { %v1408_v3 = vrot.slane %v1407_v1, 1  ;;  %v1415_v4 = vadd.f32 %v1414_v2, %v1413_v63 }
 0x39c   :  { %v1409_v10 = vadd.f32 %v1408_v3, %v1407_v1  ;;  %v1416_v28 = vrot.slane %v1415_v4, 1 }
 0x39e   :  { %v1410_v17 = vmul.f32 0.125, %v1409_v10  ;;  %v1417_v0 = vadd.f32 %v1416_v28, %v1415_v4 }
 0x3a0   :  { %v1418_v5 = vmul.f32 0.125, %v1417_v0  ;;  %v1419_v7 = vmul.f32 %v1410_v17, %v1410_v17 }
 0x3a2   :  { %v1420_v8 = vsub.f32 %v1418_v5, %v1419_v7 }
 0x3a4   :  { %v1421_v9 = vmax.f32 %v1420_v8, 0.0 }
 0x3a6   :  { %v1423_v12 = vadd.f32 1e-05, %v1421_v9 }
 0x3a8   :  { %2224 = vrsqrt.f32 %v1423_v12 }
 0x3b2   :  { %v2225_v14 = vpop.eup %2224 }
 0x3b3   :  { %v1425_v6 = vmul.f32 %v2225_v14, %v1422_v13 }
 0x3b5   :  { %v1433_v21 = vrot.slane %v1425_v6, %v2751_v27  ;;  %v1427_v22 = vmul.f32 %v1425_v6, %v1410_v17 }
 0x3b7   :  { %v1428_v23 = vsub.f32 %v1426_v20, %v1427_v22  ;;  %v1435_v11 = vmul.f32 %v1433_v21, %v1401_v59 }
 0x3b9   :  { %v1440_v16 = vrot.slane %v1428_v23, %v2751_v27 }
 0x3bb   :  { %v1442_v24 = vadd.f32 %v1440_v16, %v1435_v11 }
 0x3bd   :  { %v1443_v25 = vmax.f32 %v1442_v24, 0.0 }
 0x3bf   :  { %1814 = vmatmul.mubr.f32.vlgmr.msra.gmra.mrb[12].mxu1 %v1443_v25 }
 0x492   :  { %v1533_v29 = vpop.f32.mrb[12].mxu1 }
 0x493   :  { %v1534_v30 = vadd.f32 %v1561_v26, %v1533_v29  ;;  %v1815_v31 = vpop.f32.mrb[13].mxu1 }
 0x495   :  { %1537 = vst [vmem:[#allocation19] sm:$0xff] %v1534_v30 }
 0x496   :  { %2457 = shalt.err (!%p2454_p0)
}
 0x497   :  { %s2458_s26 = scalar_lea.hbm %s2831_s11, 128 }
 0x498   :  { %p2459_p1 = scmp.ne.s32.totalorder %s2831_s11, %s2458_s26  ;;  %p2462_p2 = scmp.lt.u32.totalorder %s2458_s26, %s2831_s11 }
 0x49a   :  { %p2464_p3 = pnand %p2462_p2, %p2459_p1 }
 0x49c   :  { %2467 = shalt.err (!%p2464_p3)
}
 0x49d   :  { %1547 = dma.vmem_to_hbm [thread:$0]  %s1545_s7, 128, %s2831_s11, [#allocation4]  }
 0x49e   :  { %2480 = dma.done.wait [#allocation4], 128  }
 0x49f   :  { %2481 = vsyncadd [#allocation4], 4294967168 }
 0x4a0   :  { %1551 = vsyncpa [#allocation3], 1 }
 0x4a1   :  { %1552 = vsyncpa [#allocation6], 1 }
 0x4a2   :  { %1553 = vsyncpa [#allocation9], 1 }
 0x4a3   :  { %1554 = vsyncpa [#allocation12], 1 }
 0x4a4   :  { %1555 = vsyncpa [#allocation15], 1 }
 0x4a5   :  { %1556 = vsyncpa [#allocation18], 1 }
 0x4a6   :  { %1557 = vsyncpa [#allocation4], 1 }

</bundles_post_ra>
